<compile_context>
chip_gen: v7x
topology: tpu7x:2x2x1
jax: 0.10.0
libtpu: 0.0.40
codegen_flags: <defaults>
</compile_context>

<pallas_src>
import functools
import math

import jax
import jax.numpy as jnp
from jax import lax
from jax.experimental import pallas as pl
from jax.experimental.pallas import tpu as pltpu


def _round_up(x, mult):
    return ((x + mult - 1) // mult) * mult


def _cosface_kernel(xn_ref, w_ref, label_ref, out_ref, scale_ref, *, s, m, tile_c):
    j = pl.program_id(0)   # class-tile index (outer; weight block changes here)
    i = pl.program_id(1)   # batch-tile index (inner; weight block is revisited)

    # Hoisted weight normalization: cache only s * 1/||w_row|| in a tiny
    # (1, tile_c) scratch once per class tile (batch axis is sequential, so
    # the weight block and the scratch persist across inner iterations).
    @pl.when(i == 0)
    def _():
        w = w_ref[...].astype(jnp.float32)
        ones = jnp.ones((1, w.shape[1]), dtype=jnp.float32)
        # Row-wise ||w||^2 produced directly in lane-major (1, tile_c) layout.
        wsq = lax.dot_general(ones, w * w,
                              dimension_numbers=(((1,), (1,)), ((), ())),
                              preferred_element_type=jnp.float32)
        # F.normalize(w, dim=1, eps=1e-12)  ==  w * rsqrt(max(||w||^2, 1e-24))
        scale_ref[...] = s * lax.rsqrt(jnp.maximum(wsq, 1e-24))

    # bf16 MXU operands, f32 accumulation. xn is pre-normalized in the wrapper.
    cos_raw = lax.dot_general(
        xn_ref[...], w_ref[...].astype(jnp.bfloat16),
        dimension_numbers=(((1,), (1,)), ((), ())),
        preferred_element_type=jnp.float32)

    # one-hot margin from a (1, tile_c) iota (broadcast against (tile_b, 1)
    # labels); padded batch rows carry label -1 and never match.
    class_ids = j * tile_c + lax.broadcasted_iota(jnp.int32, (1, tile_c), 1)
    margin = jnp.where(label_ref[...] == class_ids,
                       jnp.float32(s * m), jnp.float32(0.0))

    # out = s * (cos - m * one_hot)  with  s/||w||  folded into scale_ref.
    out_ref[...] = (cos_raw * scale_ref[...] - margin).astype(out_ref.dtype)


def _vmem_budget_bytes():
    # Generation-aware budget for the tile working set: keep well under the
    # v7x per-core 64 MiB VMEM; v5e/v6e (128 MiB) get the larger cap.
    try:
        cap = pltpu.get_tpu_info().vmem_capacity_bytes
    except Exception:  # pragma: no cover - fallback if query unavailable
        cap = 64 * 1024 * 1024
    return min(cap // 3, 28 * 1024 * 1024)


def _pick_tile_c(D, tile_b, budget_bytes):
    for tc in (2048, 1024, 512, 256, 128):
        need = (2 * tc * D * 4          # double-buffered f32 weight tile
                + 2 * tile_b * tc * 4   # double-buffered f32 output tile
                + 2 * tile_b * D * 2    # double-buffered bf16 xn tile
                + 8 * tc * 4)           # (1, tile_c) scale scratch (padded)
        if need <= budget_bytes:
            return tc
    return 128


def cosface_forward(x, weight, label, *, s=64.0, m=0.35,
                    tile_b=None, tile_c=None):
    """x: (B, D), weight: (C, D), label: (B,) int -> (B, C) f32 logits."""
    B, D = x.shape
    C, D2 = weight.shape
    assert D == D2

    # Pre-normalize x ONCE (mem-bound, fused by XLA) and cast to a bf16 MXU
    # operand; removes the per-class-tile redundant re-normalization.
    xf = x.astype(jnp.float32)
    xn = xf * lax.rsqrt(
        jnp.maximum(jnp.sum(xf * xf, axis=1, keepdims=True), 1e-24))
    xn = xn.astype(jnp.bfloat16)

    # Batch tile: MXU-friendly (<=256), multiple of 8, never larger than the
    # (8-rounded) batch itself.
    if tile_b is None:
        tile_b = 256
    tile_b = max(8, _round_up(min(tile_b, _round_up(B, 8)), 8))

    # Class tile: largest multiple of 128 that fits the VMEM budget; never
    # larger than the (128-rounded) class count.
    if tile_c is None:
        tile_c = _pick_tile_c(D, tile_b, _vmem_budget_bytes())
    tile_c = max(128, _round_up(min(tile_c, _round_up(C, 128)), 128))

    B_pad = _round_up(B, tile_b)
    C_pad = _round_up(C, tile_c)

    if B_pad != B:
        xn = jnp.pad(xn, ((0, B_pad - B), (0, 0)))
    w = weight.astype(jnp.float32)
    if C_pad != C:
        # Zero weight rows -> cos_raw is exactly 0 there; sliced off below.
        w = jnp.pad(w, ((0, C_pad - C), (0, 0)))
    lab = label.astype(jnp.int32).reshape(B, 1)
    if B_pad != B:
        lab = jnp.pad(lab, ((0, B_pad - B), (0, 0)), constant_values=-1)

    grid = (C_pad // tile_c, B_pad // tile_b)  # class tiles outer, batch inner
    kernel = functools.partial(_cosface_kernel, s=float(s), m=float(m),
                               tile_c=tile_c)

    out = pl.pallas_call(
        kernel,
        out_shape=jax.ShapeDtypeStruct((B_pad, C_pad), jnp.float32),
        grid_spec=pltpu.PrefetchScalarGridSpec(
            num_scalar_prefetch=0,
            grid=grid,
            in_specs=[
                pl.BlockSpec((tile_b, D), lambda j, i: (i, 0)),   # xn (bf16)
                pl.BlockSpec((tile_c, D), lambda j, i: (j, 0)),   # weight (f32)
                pl.BlockSpec((tile_b, 1), lambda j, i: (i, 0)),   # labels
            ],
            out_specs=pl.BlockSpec((tile_b, tile_c), lambda j, i: (i, j)),
            scratch_shapes=[pltpu.VMEM((1, tile_c), jnp.float32)],  # s / ||w||
        ),
        compiler_params=pltpu.CompilerParams(
            # Class axis may be sharded across TensorCores (v7x megacore).
            # The batch axis must stay "arbitrary" (sequential, inner) so the
            # pl.when(i == 0) scale caching remains valid.
            dimension_semantics=("parallel", "arbitrary"),
            vmem_limit_bytes=48 * 1024 * 1024,
        ),
    )(xn, w, lab)

    return out[:B, :C]


def _xavier_uniform(key, shape):
    # nn.init.xavier_uniform_: U(-a, a), a = sqrt(6 / (fan_in + fan_out))
    fan_out, fan_in = shape  # weight is (out_features, in_features)
    bound = math.sqrt(6.0 / (fan_in + fan_out))
    return jax.random.uniform(key, shape, dtype=jnp.float32,
                              minval=-bound, maxval=bound)


if __name__ == "__main__":
    key = jax.random.PRNGKey(0)
    k_x, k_w, k_l = jax.random.split(key, 3)

    # dim=512 embedding as in EfficientNet_Trim_ViT; class count kept small
    # but deliberately NOT a multiple of any tile so the padding path runs.
    B = 16
    in_features = 512
    out_features = 1000

    x = jax.random.normal(k_x, (B, in_features), dtype=jnp.float32)
    weight = _xavier_uniform(k_w, (out_features, in_features))
    label = jax.random.randint(k_l, (B,), 0, out_features, dtype=jnp.int32)

    # Small explicit tiles so the demo exercises the 2-D grid, the global
    # class-column offset, ragged-C padding, and the per-class-tile inverse
    # norm caching (multiple batch tiles per class tile).
    out = cosface_forward(x, weight, label, s=64.0, m=0.35,
                          tile_b=8, tile_c=256)
    out = jax.block_until_ready(out)

    # Reference in plain JAX (same math as the PyTorch module, f32 end to end).
    def ref(x, w, label, s=64.0, m=0.35):
        xn = x / jnp.maximum(jnp.linalg.norm(x, axis=1, keepdims=True), 1e-12)
        wn = w / jnp.maximum(jnp.linalg.norm(w, axis=1, keepdims=True), 1e-12)
        cosine = xn @ wn.T
        one_hot = jax.nn.one_hot(label, w.shape[0], dtype=cosine.dtype)
        return s * (one_hot * (cosine - m) + (1.0 - one_hot) * cosine)

    expected = ref(x, weight, label)
    assert out.shape == (B, out_features)
    # bf16 MXU operands (f32 accumulation): logits agree to well under 0.5 abs.
    assert jnp.allclose(out, expected, atol=0.5, rtol=0.02), (
        float(jnp.max(jnp.abs(out - expected))))

    print("KERNEL_OK")
</pallas_src>

<mosaic_0001>
module attributes {stable_mosaic.version = 11 : i64} {
  func.func @_cosface_kernel(%arg0: i32, %arg1: i32, %arg2: memref<8x512xbf16, #tpu.memory_space<vmem>>, %arg3: memref<256x512xf32, #tpu.memory_space<vmem>>, %arg4: memref<8x1xi32, #tpu.memory_space<vmem>>, %arg5: memref<8x256xf32, #tpu.memory_space<vmem>>, %arg6: memref<1x256xf32, #tpu.memory_space<vmem>>) attributes {dimension_semantics = [#tpu.dimension_semantics<parallel>, #tpu.dimension_semantics<arbitrary>], iteration_bounds = array<i64: 4, 2>, scalar_prefetch = 0 : i64, scratch_operands = 1 : i64, tpu.core_type = #tpu.core_type<tc>, window_params = [{transform_indices = @transform_0, window_bounds = array<i64: 8, 512>}, {transform_indices = @transform_1, window_bounds = array<i64: 256, 512>}, {transform_indices = @transform_2, window_bounds = array<i64: 8, 1>}, {transform_indices = @transform_3, window_bounds = array<i64: 8, 256>}]} {
    %c0_i32 = arith.constant 0 : i32
    %0 = arith.cmpi eq, %arg1, %c0_i32 : i32
    %1 = arith.extui %0 : i1 to i32
    %c0_i32_0 = arith.constant 0 : i32
    %2 = arith.cmpi ne, %1, %c0_i32_0 : i32
    scf.if %2 {
      %c0_12 = arith.constant 0 : index
      %c0_13 = arith.constant 0 : index
      %23 = vector.load %arg3[%c0_12, %c0_13] : memref<256x512xf32, #tpu.memory_space<vmem>>, vector<256x512xf32>
      %cst_14 = arith.constant 1.000000e+00 : f32
      %24 = vector.broadcast %cst_14 : f32 to vector<1x512xf32>
      %25 = arith.mulf %23, %23 : vector<256x512xf32>
      %cst_15 = arith.constant dense<0.000000e+00> : vector<1x256xf32>
      %26 = tpu.matmul %24, %25, %cst_15 {dimension_numbers = #tpu.dot_dimension_numbers<[1], [1], [0], [0], [0, 0, 1, 0], [], []>} : vector<1x512xf32>, vector<256x512xf32>, vector<1x256xf32> -> vector<1x256xf32>
      %cst_16 = arith.constant 1.000000e-24 : f32
      %27 = vector.broadcast %cst_16 : f32 to vector<1x256xf32>
      %28 = arith.maximumf %26, %27 : vector<1x256xf32>
      %29 = math.rsqrt %28 : vector<1x256xf32>
      %cst_17 = arith.constant 6.400000e+01 : f32
      %30 = vector.broadcast %cst_17 : f32 to vector<1x256xf32>
      %31 = arith.mulf %30, %29 : vector<1x256xf32>
      %c0_18 = arith.constant 0 : index
      %c0_19 = arith.constant 0 : index
      %32 = vector.load %arg6[%c0_18, %c0_19] : memref<1x256xf32, #tpu.memory_space<vmem>>, vector<1x256xf32>
      tpu.vector_store %arg6[%c0_18, %c0_19], %31 {strides = array<i32>} : memref<1x256xf32, #tpu.memory_space<vmem>>, vector<1x256xf32>,
    } else {
    }
    %c0 = arith.constant 0 : index
    %c0_1 = arith.constant 0 : index
    %3 = vector.load %arg2[%c0, %c0_1] : memref<8x512xbf16, #tpu.memory_space<vmem>>, vector<8x512xbf16>
    %c0_2 = arith.constant 0 : index
    %c0_3 = arith.constant 0 : index
    %4 = vector.load %arg3[%c0_2, %c0_3] : memref<256x512xf32, #tpu.memory_space<vmem>>, vector<256x512xf32>
    %5 = arith.truncf %4 : vector<256x512xf32> to vector<256x512xbf16>
    %cst = arith.constant dense<0.000000e+00> : vector<8x256xf32>
    %6 = tpu.matmul %3, %5, %cst {dimension_numbers = #tpu.dot_dimension_numbers<[1], [1], [0], [0], [0, 0, 1, 0], [], []>} : vector<8x512xbf16>, vector<256x512xbf16>, vector<8x256xf32> -> vector<8x256xf32>
    %c256_i32 = arith.constant 256 : i32
    %7 = arith.muli %arg0, %c256_i32 : i32
    %8 = tpu.iota {dimensions = array<i32: 1>} : vector<1x256xi32>
    %9 = vector.broadcast %7 : i32 to vector<1x256xi32>
    %10 = arith.addi %9, %8 : vector<1x256xi32>
    %c0_4 = arith.constant 0 : index
    %c0_5 = arith.constant 0 : index
    %11 = vector.load %arg4[%c0_4, %c0_5] : memref<8x1xi32, #tpu.memory_space<vmem>>, vector<8x1xi32>
    %12 = vector.broadcast %11 : vector<8x1xi32> to vector<8x256xi32>
    %13 = vector.broadcast %10 : vector<1x256xi32> to vector<8x256xi32>
    %14 = arith.cmpi eq, %12, %13 : vector<8x256xi32>
    %cst_6 = arith.constant 2.240000e+01 : f32
    %cst_7 = arith.constant 0.000000e+00 : f32
    %15 = vector.broadcast %cst_6 : f32 to vector<8x256xf32>
    %16 = vector.broadcast %cst_7 : f32 to vector<8x256xf32>
    %17 = arith.select %14, %15, %16 : vector<8x256xi1>, vector<8x256xf32>
    %c0_8 = arith.constant 0 : index
    %c0_9 = arith.constant 0 : index
    %18 = vector.load %arg6[%c0_8, %c0_9] : memref<1x256xf32, #tpu.memory_space<vmem>>, vector<1x256xf32>
    %19 = vector.broadcast %18 : vector<1x256xf32> to vector<8x256xf32>
    %20 = arith.mulf %6, %19 : vector<8x256xf32>
    %21 = arith.subf %20, %17 : vector<8x256xf32>
    %c0_10 = arith.constant 0 : index
    %c0_11 = arith.constant 0 : index
    %22 = vector.load %arg5[%c0_10, %c0_11] : memref<8x256xf32, #tpu.memory_space<vmem>>, vector<8x256xf32>
    tpu.vector_store %arg5[%c0_10, %c0_11], %21 {strides = array<i32>} : memref<8x256xf32, #tpu.memory_space<vmem>>, vector<8x256xf32>,
    return
  }
  func.func @transform_0(%arg0: i32, %arg1: i32) -> (i32, i32) {
    %c0_i32 = arith.constant 0 : i32
    %c0_i32_0 = arith.constant 0 : i32
    return %arg1, %c0_i32 : i32, i32
  }
  func.func @transform_1(%arg0: i32, %arg1: i32) -> (i32, i32) {
    %c0_i32 = arith.constant 0 : i32
    %c0_i32_0 = arith.constant 0 : i32
    return %arg0, %c0_i32 : i32, i32
  }
  func.func @transform_2(%arg0: i32, %arg1: i32) -> (i32, i32) {
    %c0_i32 = arith.constant 0 : i32
    %c0_i32_0 = arith.constant 0 : i32
    return %arg1, %c0_i32 : i32, i32
  }
  func.func @transform_3(%arg0: i32, %arg1: i32) -> (i32, i32) {
    %c0_i32 = arith.constant 0 : i32
    return %arg1, %arg0 : i32, i32
  }
}

</mosaic_0001>

<bundles_post_ra>
// kernel: tpu_custom_call.1
= control target key start
LH: loop header
LB: loop body
LE: loop exit
PB: predicated region body
PF: predicated region fallthrough
CT: control target
= control target key end

     0   :  { %s2329_s0 = inlined_call_operand.hbm [shape: bf16[16,512], index: 0, kind: input, shape index: {}]   ;;  %s2330_s1 = inlined_call_operand.hbm [shape: f32[1024,512], index: 1, kind: input, shape index: {}]   ;;  %s2331_s2 = inlined_call_operand.vmem [shape: s32[16,1], index: 2, kind: input, shape index: {}]   ;;  %s2332_s3 = inlined_call_operand.hbm [shape: f32[16,1024], index: 3, kind: output, shape index: {}]  }
   0x1   :  { %2340 = sst [smem:[#allocation19_spill]] %s2329_s0 }
   0x2   :  { %8 = vsyncpa [#allocation4], 0 }
   0x3   :  { %10 = vsyncpa [#allocation4 + $0x1], 0 }
   0x4   :  { %11 = vsyncpa [#allocation7], 0 }
   0x5   :  { %13 = vsyncpa [#allocation7 + $0x1], 0 }
   0x6   :  { %14 = vsyncpa [#allocation5], 0 }
   0x7   :  { %16 = vsyncpa [#allocation5 + $0x1], 0  ;;  %s1701_s12 = smov 0   ;;  %s1703_s13 = smov 0  }
   0x8   :  { %s1705_s14 = smov 0   ;;  %s1707_s15 = smov 0  }
   0x9   :  { %s1709_s16 = smov 0   ;;  %s1711_s17 = smov 0  }
   0xa   :  { %s1713_s18 = smov 0   ;;  %s1715_s19 = smov 0  }
   0xb   :  { %s1717_s20 = smov 0   ;;  %s1719_s21 = smov 0  }
   0xc   :  { %s1721_s22 = smov 0   ;;  %s1723_s23 = smov 0  }
   0xd   :  { %s1725_s24 = smov 0   ;;  %s1727_s25 = smov 0  }
   0xe LB: > { %2341 = sst [smem:[#allocation12_spill]] %s1662_s23  ;;  %s1151_s26 = sadd.s32 4294967295, %s1670_s25   ;;  %s1670_s25 = sphi %s1727_s25, %s22_s25   ;;  %s1666_s24 = sphi %s1725_s24, %s2372_s24   ;;  %s1662_s23 = sphi %s1723_s23, %s2371_s23   ;;  %s1658_s22 = sphi %s1721_s22, %s2384_s22   ;;  %s1654_s21 = sphi %s1719_s21, %s2383_s21   ;;  %s1650_s20 = sphi %s1717_s20, %s2382_s20   ;;  %s1646_s19 = sphi %s1715_s19, %s2381_s19   ;;  %s1642_s18 = sphi %s1713_s18, %s2380_s18   ;;  %s1638_s17 = sphi %s1711_s17, %s2379_s17   ;;  %s1634_s16 = sphi %s1709_s16, %s2378_s16   ;;  %s1630_s15 = sphi %s1707_s15, %s2377_s15   ;;  %s1626_s14 = sphi %s1705_s14, %s2376_s14   ;;  %s1622_s13 = sphi %s1703_s13, %s2375_s13   ;;  %s1618_s12 = sphi %s1701_s12, %s2374_s12  }
   0xf   : > { %2342 = sst [smem:[#allocation13_spill]] %s1666_s24  ;;  %s31_s28 = sadd.s32 1, %s1662_s23 }
  0x10   : > { %s34_s29 = sadd.s32 1, %s1666_s24  ;;  %p32_p0 = scmp.ge.s32.totalorder %s31_s28, 2 }
  0x11   : > { %s41_s30 = sadd.s32 1, %s1650_s20  ;;  %p48_p1 = scmp.ne.s32.totalorder %s1650_s20, %s1646_s19 }
  0x12   : > { %p49_p2 = scmp.eq.s32.totalorder %s1670_s25, 0  ;;  %s2386_s28 = smov (%p32_p0, %s31_s28), 0 }
  0x13   : > { %2343 = sst [smem:[#allocation14_spill]] %s2386_s28  ;;  %s2388_s29 = smov (!%p32_p0, %s34_s29), %s1666_s24 }
  0x14   : > { %s38_s4 = ssub.s32 %s1662_s23, %s2386_s28  ;;  %p1784_p3 = por %p49_p2, %p48_p1 }
  0x15   : > { %p36_p4 = scmp.ge.s32.totalorder %s2388_s29, 4  ;;  %p39_p5 = scmp.eq.s32.totalorder %s38_s4, 0 }
  0x16   : > { %p54_p6 = scmp.ne.s32.totalorder %s1646_s19, %s1642_s18  ;;  %p55_p7 = scmp.eq.s32.totalorder %s1151_s26, 0 }
  0x17   : > { %s2390_s29 = smov (%p36_p4, %s2388_s29), 0  ;;  %s67_s9 = sadd.s32 1, %s1638_s17 }
  0x18   : > { %2345 = sst [smem:[#allocation15_spill]] %s2390_s29  ;;  %p1796_p8 = por %p55_p7, %p54_p6 }
  0x19   : > { %s1794_s6 = scalar_select %p39_p5, %s1650_s20, %s41_s30  }
  0x1a   : > { %s2347_s7 = scalar_select %p1796_p8, 1, 0 }
  0x1b   : > { %2346 = sst [smem:[#allocation16_spill]] %s1794_s6  ;;  %s64_s8 = ssub.s32 %s1666_s24, %s2390_s29 }
  0x1c   : > { %p65_p9 = scmp.eq.s32.totalorder %s64_s8, 0  ;;  %p74_p10 = scmp.ne.s32.totalorder %s1638_s17, %s1634_s16 }
  0x1d   : > { %p80_p11 = scmp.ne.s32.totalorder %s1634_s16, %s1630_s15  ;;  %s118_s30 = sor.u32 %s64_s8, %s38_s4 }
  0x1e   : > { %s1808_s10 = scalar_select %p65_p9, %s1638_s17, %s67_s9  }
  0x1f   : > { %p1812_p12 = por %p74_p10, %p49_p2  ;;  %p1816_p13 = por %p80_p11, %p55_p7 }
  0x20   : > { %2348 = sst [smem:[#allocation17_spill]] %s1808_s10  ;;  %s121_s27 = sadd.s32 1, %s1626_s14 }
  0x21   : > { %s2350_s18 = scalar_select %p1816_p13, 1, 0 }
  0x22   : > { %p119_p0 = scmp.eq.s32.totalorder %s118_s30, 0  ;;  %p131_p1 = scmp.ne.s32.totalorder %s1626_s14, %s1622_s13 }
  0x23   : > { %p132_p4 = scmp.eq.s32.totalorder %s1151_s26, 7  ;;  %p137_p5 = scmp.ne.s32.totalorder %s1622_s13, %s1618_s12 }
  0x24   : > { %s1828_s15 = scalar_select %p119_p0, %s1626_s14, %s121_s27  }
  0x25   : > { %p1830_p2 = por %p132_p4, %p131_p1  ;;  %s2353_s29 = sadd.s32 4294967294, %s1670_s25  }
  0x26   : > { %2351 = sst [smem:[#allocation18_spill]] %s1828_s15  ;;  %p138_p6 = scmp.eq.s32.totalorder %s2353_s29, 7 }
  0x27   : > { %s2352_s9 = scalar_select %p1830_p2, 1, 0 }
  0x28   : > { %p1331_p7 = scmp.lt.s32.totalorder %s1670_s25, 8  ;;  %p1837_p9 = por %p138_p6, %p137_p5 }
  0x29   : > { %s158_s8 = sand.u32 1, %s1650_s20   ;;  %s1179_s28 = sshll.u32 %s1662_s23, 8 }
  0x2a   : > { %s2354_s4 = scalar_select %p1837_p9, 1, 0 }
  0x2b   : > { %s1155_s30 = sshll.u32 %s158_s8, 4  ;;  %s2355_s0 = sld [smem:[#allocation19_spill]] }
  0x2c   : > { %s162_s27 = scalar_lea.vmem [#allocation3], %s1155_s30  ;;  %p1852_p10 = pnand %p1331_p7, %p1784_p3 }
  0x2d   : > { %s170_s15 = sshll.u32 %s162_s27, 4  ;;  %p1858_p11 = pnand %p1331_p7, %p1812_p12  ;;  %s1848_s15 = int_to_ptr.vmem [resolvable:$true] %s170_s15 }
  0x2e   : > { %p1462_p5 = pneg %p1852_p10 }
  0x31   : > { %s1846_s10 = scalar_lea.hbm %s2355_s0, %s1179_s28  ;;  %s159_s28 = scalar_lea.sflag [#allocation4], %s158_s8 }
  0x32   : > { %s1460_s30 = scalar_lea.hbm %s1846_s10, 256  ;;  %s1465_s11 = scalar_lea.hbm %s2355_s0, 512 }
  0x33   : > { %p1461_p4 = scmp.ne.s32.totalorder %s1846_s10, %s1460_s30  ;;  %p1466_p12 = scmp.lt.u32.totalorder %s1846_s10, %s2355_s0 }
  0x34   : > { %p1467_p7 = scmp.lt.u32.totalorder %s1465_s11, %s1460_s30  ;;  %p1469_p1 = scmp.lt.u32.totalorder %s1460_s30, %s1846_s10 }
  0x35   : > { %p1463_p3 = pnand %p1462_p5, %p1461_p4 }
  0x36   : > { %p1468_p0 = por %p1467_p7, %p1466_p12 }
  0x37   : > { %p1464_p6 = pneg %p1463_p3 }
  0x38   : > { %p1470_p9 = por %p1469_p1, %p1468_p0 }
  0x3a   : > { %p1471_p2 = pnand %p1470_p9, %p1464_p6 }
  0x3c   : > { %1474 = shalt.err (!%p1471_p2)
}
  0x3d   : > { %s1475_s8 = scalar_lea.vmem %s1848_s15, 256  ;;  %s1672_s5 = smov [#allocation3]  }
  0x3e   : > { %p1476_p4 = scmp.ne.s32.totalorder %s1848_s15, %s1475_s8  ;;  %s1480_s26 = sshll.u32 %s1672_s5, 4  ;;  %s1481_s26 = int_to_ptr.vmem [resolvable:$false] %s1480_s26 }
  0x3f   : > { %s1482_s23 = scalar_lea.vmem %s1481_s26, 512  ;;  %p1483_p8 = scmp.lt.s32.totalorder %s1848_s15, %s1481_s26 }
  0x40   : > { %p1478_p3 = pnand %p1476_p4, %p1462_p5  ;;  %p1484_p12 = scmp.lt.s32.totalorder %s1482_s23, %s1475_s8 }
  0x42   : > { %p1479_p13 = pneg %p1478_p3  ;;  %p1485_p7 = por %p1484_p12, %p1483_p8 }
  0x44   : > { %p1486_p0 = pnand %p1485_p7, %p1479_p13 }
  0x46   : > { %1489 = shalt.err (!%p1486_p0)
}
  0x47   : > { %1323 = dma.hbm_to_vmem [thread:$0]  (!%p1852_p10), %s1846_s10, 256, %s1848_s15, %s159_s28  }
  0x48   : > { %p2358_p2 = scmp.lt.s32.totalorder %s1670_s25, 9  ;;  %p2359_p9 = scmp.ge.s32.totalorder %s1670_s25, 1 }
  0x49   : > { %s177_s11 = sand.u32 1, %s1638_s17   ;;  %s1181_s27 = sshll.u32 %s1666_s24, 14 }
  0x4a   : > { %p1893_p1 = pnand %p2359_p9, %p2358_p2  ;;  %s1158_s8 = sshll.u32 %s177_s11, 10 }
  0x4b   : > { %s1902_s26 = scalar_lea.hbm %s2330_s1, %s1181_s27  ;;  %s181_s23 = scalar_lea.vmem [#allocation6], %s1158_s8 }
  0x4c   : > { %s189_s10 = sshll.u32 %s181_s23, 4  ;;  %s1906_s15 = scalar_lea.sflag [#allocation7], %s177_s11  ;;  %s1904_s10 = int_to_ptr.vmem [resolvable:$true] %s189_s10 }
  0x4d   : > { %s1490_s28 = scalar_lea.hbm %s1902_s26, 16384  ;;  %p1492_p13 = pneg %p1858_p11 }
  0x4e   : > { %p1491_p8 = scmp.ne.s32.totalorder %s1902_s26, %s1490_s28  ;;  %s1495_s29 = scalar_lea.hbm %s2330_s1, 65536 }
  0x4f   : > { %p1496_p6 = scmp.lt.u32.totalorder %s1902_s26, %s2330_s1  ;;  %p1497_p4 = scmp.lt.u32.totalorder %s1495_s29, %s1490_s28 }
  0x50   : > { %p1493_p10 = pnand %p1492_p13, %p1491_p8  ;;  %p1499_p12 = scmp.lt.u32.totalorder %s1490_s28, %s1902_s26 }
  0x51   : > { %p1498_p3 = por %p1497_p4, %p1496_p6 }
  0x52   : > { %p1494_p5 = pneg %p1493_p10 }
  0x53   : > { %p1500_p7 = por %p1499_p12, %p1498_p3 }
  0x55   : > { %p1501_p0 = pnand %p1500_p7, %p1494_p5 }
  0x57   : > { %1504 = shalt.err (!%p1501_p0)
}
  0x58   : > { %s1505_s11 = scalar_lea.vmem %s1904_s10, 16384  ;;  %s1673_s8 = smov [#allocation6]  }
  0x59   : > { %p1506_p2 = scmp.ne.s32.totalorder %s1904_s10, %s1505_s11  ;;  %s1510_s23 = sshll.u32 %s1673_s8, 4  ;;  %s1511_s23 = int_to_ptr.vmem [resolvable:$false] %s1510_s23 }
  0x5a   : > { %s1512_s0 = scalar_lea.vmem %s1511_s23, 32768  ;;  %p1513_p10 = scmp.lt.s32.totalorder %s1904_s10, %s1511_s23 }
  0x5b   : > { %p1508_p9 = pnand %p1506_p2, %p1492_p13  ;;  %p1514_p6 = scmp.lt.s32.totalorder %s1512_s0, %s1505_s11 }
  0x5d   : > { %p1509_p8 = pneg %p1508_p9  ;;  %p1515_p4 = por %p1514_p6, %p1513_p10 }
  0x5f   : > { %p1516_p3 = pnand %p1515_p4, %p1509_p8 }
  0x61   : > { %1519 = shalt.err (!%p1516_p3)
}
  0x62   : > { %s1674_s24 = smov 512   ;;  %s1675_s28 = smov 32  }
  0x63   : > { %1326 = dma.hbm_to_vmem [thread:$0]  (!%p1858_p11), %s1902_s26, 16384, %s1904_s10, %s1906_s15, %s1674_s24, %s1674_s24, %s1675_s28  }
  0x64   : > { %208 = sbr.rel (%p1893_p1) target bundleno = 853 (0x355), region = 32  ;;  %s210_s27 = sand.u32 (!%p1893_p1), 1, %s1646_s19  }
  0x65   : > { %s1937_s5 = sshll.u32 (!%p1893_p1), %s210_s27, 4  ;;  %s211_s29 = scalar_lea.sflag (!%p1893_p1), [#allocation4], %s210_s27 }
  0x66   : > { %s214_s11 = scalar_lea.vmem (!%p1893_p1), [#allocation3], %s1937_s5  ;;  %p2361_p13 = scmp.ne.s32.totalorder (!%p1893_p1), %s2347_s7, 0 }
  0x6b   : > { %1605 = dma.done.wait (%p2361_p13), %s211_s29, 256  }
  0x6c   : > { %1607 = vsyncadd (%p2361_p13), %s211_s29, 4294967040  ;;  %s219_s6 = sand.u32 1, %s1634_s16   ;;  %p2362_p11 = scmp.ne.s32.totalorder %s2350_s18, 0 }
  0x6d   : > { %s1164_s26 = sshll.u32 %s219_s6, 10  ;;  %s220_s10 = scalar_lea.sflag [#allocation7], %s219_s6 }
  0x6e   : > { %s1945_s30 = scalar_lea.vmem [#allocation6], %s1164_s26 }
  0x6f   : > { %1609 = dma.done.wait (%p2362_p11), %s220_s10, 16384  }
  0x70   : > { %1611 = vsyncadd (%p2362_p11), %s220_s10, 4294950912  ;;  %s252_s15 = sand.u32 1, %s1622_s13   ;;  %p256_p1 = scmp.lt.s32.totalorder %s1654_s21, 1 }
  0x71   : > { %s1165_s7 = sshll.u32 %s252_s15, 4  ;;  %p1167_p5 = scmp.ne.s32.totalorder %s1654_s21, 0 }
  0x72   : > { %s257_s8 = scalar_select %p256_p1, %s1654_s21, 1 }
  0x73   : > { %s1961_s27 = scalar_lea.vmem [#allocation8], %s1165_s7  ;;  %264 = sbr.rel (%p1167_p5) target bundleno = 487 (0x1e7), region = 44  ;;  %v266_v0 = vld [vmem:[%s1945_s30 + $0x8] sm:$0xff] (!%p1167_p5)  ;;  %v268_v2 = vld [vmem:[%s1945_s30 + $0x18] sm:$0xff] (!%p1167_p5)  ;;  %v265_v7 = vld [vmem:[%s1945_s30] sm:$0xff] (!%p1167_p5)  ;;  %v1676_v9 = vmov (!%p1167_p5), 1.0  }
  0x74   : > { %s1166_s23 = sshll.u32 %s257_s8, 3  ;;  %v270_v1 = vld [vmem:[%s1945_s30 + $0x28] sm:$0xff] (!%p1167_p5)  ;;  %v394_v3 = vmul.f32 (!%p1167_p5), %v266_v0, %v266_v0  ;;  %v272_v5 = vld [vmem:[%s1945_s30 + $0x38] sm:$0xff] (!%p1167_p5)  ;;  %v396_v6 = vmul.f32 (!%p1167_p5), %v268_v2, %v268_v2  ;;  %v269_v8 = vld [vmem:[%s1945_s30 + $0x20] sm:$0xff] (!%p1167_p5)  ;;  %585 = vmatprep.mubr.f32.mxu1 (!%p1167_p5), %v1676_v9  ;;  %656 = vmatprep.mubr.f32.mxu0 (!%p1167_p5), %v1676_v9  ;;  %v393_v11 = vmul.f32 (!%p1167_p5), %v265_v7, %v265_v7 }
  0x75   : > { %s1959_s28 = scalar_lea.vmem %s2331_s2, %s1166_s23  ;;  %v398_v4 = vmul.f32 (!%p1167_p5), %v270_v1, %v270_v1  ;;  %v400_v10 = vmul.f32 (!%p1167_p5), %v272_v5, %v272_v5  ;;  %v397_v12 = vmul.f32 (!%p1167_p5), %v269_v8, %v269_v8  ;;  %v267_v13 = vld [vmem:[%s1945_s30 + $0x10] sm:$0xff] (!%p1167_p5)  ;;  %v274_v15 = vld [vmem:[%s1945_s30 + $0x48] sm:$0xff] (!%p1167_p5)  ;;  %v276_v21 = vld [vmem:[%s1945_s30 + $0x58] sm:$0xff] (!%p1167_p5) }
  0x76   : > { %v271_v14 = vld [vmem:[%s1945_s30 + $0x30] sm:$0xff] (!%p1167_p5)  ;;  %v395_v17 = vmul.f32 (!%p1167_p5), %v267_v13, %v267_v13  ;;  %v278_v19 = vld [vmem:[%s1945_s30 + $0x68] sm:$0xff] (!%p1167_p5)  ;;  %v402_v20 = vmul.f32 (!%p1167_p5), %v274_v15, %v274_v15  ;;  %v280_v22 = vld [vmem:[%s1945_s30 + $0x78] sm:$0xff] (!%p1167_p5)  ;;  %v404_v26 = vmul.f32 (!%p1167_p5), %v276_v21, %v276_v21 }
  0x77   : > { %v1182_v16 = vpack.c.bf16 (!%p1167_p5), %v398_v4, %v394_v3  ;;  %v399_v18 = vmul.f32 (!%p1167_p5), %v271_v14, %v271_v14  ;;  %v1246_v23 = vpack.c.bf16 (!%p1167_p5), %v400_v10, %v396_v6  ;;  %v1184_v24 = vpack.c.bf16 (!%p1167_p5), %v397_v12, %v393_v11  ;;  %v273_v27 = vld [vmem:[%s1945_s30 + $0x40] sm:$0xff] (!%p1167_p5)  ;;  %v275_v29 = vld [vmem:[%s1945_s30 + $0x50] sm:$0xff] (!%p1167_p5)  ;;  %v282_v34 = vld [vmem:[%s1945_s30 + $0x88] sm:$0xff] (!%p1167_p5) }
  0x78   : > { %v406_v25 = vmul.f32 (!%p1167_p5), %v278_v19, %v278_v19  ;;  %v277_v28 = vld [vmem:[%s1945_s30 + $0x60] sm:$0xff] (!%p1167_p5)  ;;  %v408_v31 = vmul.f32 (!%p1167_p5), %v280_v22, %v280_v22  ;;  %v401_v32 = vmul.f32 (!%p1167_p5), %v273_v27, %v273_v27  ;;  %v279_v33 = vld [vmem:[%s1945_s30 + $0x70] sm:$0xff] (!%p1167_p5)  ;;  %v286_v35 = vld [vmem:[%s1945_s30 + $0xa8] sm:$0xff] (!%p1167_p5)  ;;  %v403_v38 = vmul.f32 (!%p1167_p5), %v275_v29, %v275_v29 }
  0x79   : > { %1183 = vmatprep.subr.bf16.mxu1 (!%p1167_p5), %v1182_v16  ;;  %v1248_v30 = vpack.c.bf16 (!%p1167_p5), %v399_v18, %v395_v17  ;;  %1247 = vmatprep.subr.bf16.mxu0 (!%p1167_p5), %v1246_v23  ;;  %v405_v37 = vmul.f32 (!%p1167_p5), %v277_v28, %v277_v28  ;;  %v284_v39 = vld [vmem:[%s1945_s30 + $0x98] sm:$0xff] (!%p1167_p5)  ;;  %v407_v42 = vmul.f32 (!%p1167_p5), %v279_v33, %v279_v33  ;;  %v281_v50 = vld [vmem:[%s1945_s30 + $0x80] sm:$0xff] (!%p1167_p5)  ;;  %v283_v52 = vld [vmem:[%s1945_s30 + $0x90] sm:$0xff] (!%p1167_p5) }
  0x7a   : > { %1185 = vmatpush1.bf16.xpose.msra.mxu1 %v1184_v24  ;;  %v1186_v36 = vpack.c.bf16 %v406_v25, %v402_v20  ;;  %v288_v40 = vld [vmem:[%s1945_s30 + $0xb8] sm:$0xff]  ;;  %v1250_v41 = vpack.c.bf16 %v408_v31, %v404_v26  ;;  %v410_v43 = vmul.f32 %v282_v34, %v282_v34  ;;  %v414_v44 = vmul.f32 %v286_v35, %v286_v35  ;;  %v285_v51 = vld [vmem:[%s1945_s30 + $0xa0] sm:$0xff]  ;;  %v287_v54 = vld [vmem:[%s1945_s30 + $0xb0] sm:$0xff] }
  0x7b   : > { %1249 = vmatpush1.bf16.xpose.msra.mxu0 %v1248_v30  ;;  %v412_v45 = vmul.f32 %v284_v39, %v284_v39  ;;  %v416_v46 = vmul.f32 %v288_v40, %v288_v40  ;;  %v1188_v47 = vpack.c.bf16 %v405_v37, %v401_v32  ;;  %v1252_v48 = vpack.c.bf16 %v407_v42, %v403_v38  ;;  %v290_v55 = vld [vmem:[%s1945_s30 + $0xc8] sm:$0xff]  ;;  %v292_v57 = vld [vmem:[%s1945_s30 + $0xd8] sm:$0xff]  ;;  %v289_v6 = vld [vmem:[%s1945_s30 + $0xc0] sm:$0xff] }
  0x7c   : > { %1187 = vmatprep.subr.bf16.mxu1 %v1186_v36  ;;  %1251 = vmatprep.subr.bf16.mxu0 %v1250_v41  ;;  %v1190_v49 = vpack.c.bf16 %v414_v44, %v410_v43  ;;  %v294_v56 = vld [vmem:[%s1945_s30 + $0xe8] sm:$0xff]  ;;  %v296_v58 = vld [vmem:[%s1945_s30 + $0xf8] sm:$0xff]  ;;  %v409_v59 = vmul.f32 %v281_v50, %v281_v50  ;;  %v413_v60 = vmul.f32 %v285_v51, %v285_v51  ;;  %v293_v7 = vld [vmem:[%s1945_s30 + $0xe0] sm:$0xff] }
  0x7d   : > { %v1254_v53 = vpack.c.bf16 %v416_v46, %v412_v45  ;;  %v411_v61 = vmul.f32 %v283_v52, %v283_v52  ;;  %v415_v62 = vmul.f32 %v287_v54, %v287_v54  ;;  %v418_v63 = vmul.f32 %v290_v55, %v290_v55  ;;  %v291_v8 = vld [vmem:[%s1945_s30 + $0xd0] sm:$0xff]  ;;  %v298_v12 = vld [vmem:[%s1945_s30 + $0x108] sm:$0xff]  ;;  %v300_v14 = vld [vmem:[%s1945_s30 + $0x118] sm:$0xff] }
  0x7e   : > { %v422_v0 = vmul.f32 %v294_v56, %v294_v56  ;;  %v420_v1 = vmul.f32 %v292_v57, %v292_v57  ;;  %v424_v2 = vmul.f32 %v296_v58, %v296_v58  ;;  %v1192_v3 = vpack.c.bf16 %v413_v60, %v409_v59  ;;  %v295_v11 = vld [vmem:[%s1945_s30 + $0xf0] sm:$0xff]  ;;  %v302_v13 = vld [vmem:[%s1945_s30 + $0x128] sm:$0xff]  ;;  %v304_v15 = vld [vmem:[%s1945_s30 + $0x138] sm:$0xff] }
  0x7f   : > { %v1256_v4 = vpack.c.bf16 %v415_v62, %v411_v61  ;;  %v417_v16 = vmul.f32 %v289_v6, %v289_v6  ;;  %v421_v17 = vmul.f32 %v293_v7, %v293_v7  ;;  %v419_v18 = vmul.f32 %v291_v8, %v291_v8  ;;  %v297_v27 = vld [vmem:[%s1945_s30 + $0x100] sm:$0xff]  ;;  %v299_v29 = vld [vmem:[%s1945_s30 + $0x110] sm:$0xff]  ;;  %v306_v32 = vld [vmem:[%s1945_s30 + $0x148] sm:$0xff] }
  0x80   : > { %v1194_v5 = vpack.c.bf16 %v422_v0, %v418_v63  ;;  %v1258_v10 = vpack.c.bf16 %v424_v2, %v420_v1  ;;  %v423_v19 = vmul.f32 %v295_v11, %v295_v11  ;;  %v426_v20 = vmul.f32 %v298_v12, %v298_v12  ;;  %v301_v28 = vld [vmem:[%s1945_s30 + $0x120] sm:$0xff]  ;;  %v303_v31 = vld [vmem:[%s1945_s30 + $0x130] sm:$0xff]  ;;  %v310_v33 = vld [vmem:[%s1945_s30 + $0x168] sm:$0xff] }
  0x81   : > { %v430_v21 = vmul.f32 %v302_v13, %v302_v13  ;;  %v428_v22 = vmul.f32 %v300_v14, %v300_v14  ;;  %v432_v23 = vmul.f32 %v304_v15, %v304_v15  ;;  %v1196_v24 = vpack.c.bf16 %v421_v17, %v417_v16  ;;  %v308_v34 = vld [vmem:[%s1945_s30 + $0x158] sm:$0xff]  ;;  %v311_v51 = vld [vmem:[%s1945_s30 + $0x170] sm:$0xff]  ;;  %v314_v52 = vld [vmem:[%s1945_s30 + $0x188] sm:$0xff] }
  0x82   : > { %1189 = vmatpush1.bf16.xpose.msra.mxu1 %v1188_v47  ;;  %v1260_v25 = vpack.c.bf16 %v423_v19, %v419_v18  ;;  %v312_v35 = vld [vmem:[%s1945_s30 + $0x178] sm:$0xff]  ;;  %v425_v36 = vmul.f32 %v297_v27, %v297_v27  ;;  %v429_v37 = vmul.f32 %v301_v28, %v301_v28  ;;  %v427_v38 = vmul.f32 %v299_v29, %v299_v29  ;;  %v305_v47 = vld [vmem:[%s1945_s30 + $0x140] sm:$0xff]  ;;  %v319_v7 = vld [vmem:[%s1945_s30 + $0x1b0] sm:$0xff] }
  0x83   : > { %1253 = vmatpush1.bf16.xpose.msra.mxu0 %v1252_v48  ;;  %1191 = vmatprep.subr.bf16.mxu1 %v1190_v49  ;;  %v1198_v26 = vpack.c.bf16 %v430_v21, %v426_v20  ;;  %v1262_v30 = vpack.c.bf16 %v432_v23, %v428_v22  ;;  %v431_v39 = vmul.f32 %v303_v31, %v303_v31  ;;  %v309_v48 = vld [vmem:[%s1945_s30 + $0x160] sm:$0xff]  ;;  %v307_v49 = vld [vmem:[%s1945_s30 + $0x150] sm:$0xff]  ;;  %v316_v54 = vld [vmem:[%s1945_s30 + $0x198] sm:$0xff] }
  0x84   : > { %1255 = vmatprep.subr.bf16.mxu0 %v1254_v53  ;;  %v434_v40 = vmul.f32 %v306_v32, %v306_v32  ;;  %v438_v41 = vmul.f32 %v310_v33, %v310_v33  ;;  %v436_v42 = vmul.f32 %v308_v34, %v308_v34  ;;  %v440_v43 = vmul.f32 %v312_v35, %v312_v35  ;;  %v318_v53 = vld [vmem:[%s1945_s30 + $0x1a8] sm:$0xff]  ;;  %v320_v55 = vld [vmem:[%s1945_s30 + $0x1b8] sm:$0xff]  ;;  %v327_v28 = vld [vmem:[%s1945_s30 + $0x1f0] sm:$0xff] }
  0x85   : > { %v1200_v44 = vpack.c.bf16 %v429_v37, %v425_v36  ;;  %v1264_v45 = vpack.c.bf16 %v431_v39, %v427_v38  ;;  %v433_v56 = vmul.f32 %v305_v47, %v305_v47  ;;  %v437_v57 = vmul.f32 %v309_v48, %v309_v48  ;;  %v322_v8 = vld [vmem:[%s1945_s30 + $0x1c8] sm:$0xff]  ;;  %v324_v11 = vld [vmem:[%s1945_s30 + $0x1d8] sm:$0xff]  ;;  %v335_v48 = vld [vmem:[%s1945_s30 + $0x230] sm:$0xff] }
  0x86   : > { %v1202_v46 = vpack.c.bf16 %v438_v41, %v434_v40  ;;  %v1266_v50 = vpack.c.bf16 %v440_v43, %v436_v42  ;;  %v435_v58 = vmul.f32 %v307_v49, %v307_v49  ;;  %v439_v59 = vmul.f32 %v311_v51, %v311_v51  ;;  %v328_v12 = vld [vmem:[%s1945_s30 + $0x1f8] sm:$0xff]  ;;  %v330_v29 = vld [vmem:[%s1945_s30 + $0x208] sm:$0xff] }
  0x87   : > { %v442_v60 = vmul.f32 %v314_v52, %v314_v52  ;;  %v446_v61 = vmul.f32 %v318_v53, %v318_v53  ;;  %v444_v62 = vmul.f32 %v316_v54, %v316_v54  ;;  %v448_v63 = vmul.f32 %v320_v55, %v320_v55  ;;  %v332_v31 = vld [vmem:[%s1945_s30 + $0x218] sm:$0xff]  ;;  %v338_v49 = vld [vmem:[%s1945_s30 + $0x248] sm:$0xff] }
  0x88   : > { %v1204_v0 = vpack.c.bf16 %v437_v57, %v433_v56  ;;  %v1268_v1 = vpack.c.bf16 %v439_v59, %v435_v58  ;;  %v447_v16 = vmul.f32 %v319_v7, %v319_v7  ;;  %v450_v17 = vmul.f32 %v322_v8, %v322_v8  ;;  %v336_v32 = vld [vmem:[%s1945_s30 + $0x238] sm:$0xff] }
  0x89   : > { %v1206_v2 = vpack.c.bf16 %v446_v61, %v442_v60  ;;  %v1270_v6 = vpack.c.bf16 %v448_v63, %v444_v62  ;;  %v452_v19 = vmul.f32 %v324_v11, %v324_v11  ;;  %v456_v20 = vmul.f32 %v328_v12, %v328_v12  ;;  %v340_v51 = vld [vmem:[%s1945_s30 + $0x258] sm:$0xff] }
  0x8a   : > { %1193 = vmatpush1.bf16.xpose.msra.mxu1 %v1192_v3  ;;  %v313_v3 = vld [vmem:[%s1945_s30 + $0x180] sm:$0xff]  ;;  %v455_v36 = vmul.f32 %v327_v28, %v327_v28  ;;  %v458_v37 = vmul.f32 %v330_v29, %v330_v29  ;;  %v460_v39 = vmul.f32 %v332_v31, %v332_v31  ;;  %v464_v40 = vmul.f32 %v336_v32, %v336_v32  ;;  %v344_v52 = vld [vmem:[%s1945_s30 + $0x278] sm:$0xff] }
  0x8b   : > { %1257 = vmatpush1.bf16.xpose.msra.mxu0 %v1256_v4  ;;  %1195 = vmatprep.subr.bf16.mxu1 %v1194_v5  ;;  %v317_v4 = vld [vmem:[%s1945_s30 + $0x1a0] sm:$0xff]  ;;  %v315_v5 = vld [vmem:[%s1945_s30 + $0x190] sm:$0xff]  ;;  %v441_v13 = vmul.f32 %v313_v3, %v313_v3  ;;  %v1274_v27 = vpack.c.bf16 %v456_v20, %v452_v19  ;;  %v463_v56 = vmul.f32 %v335_v48, %v335_v48  ;;  %v348_v7 = vld [vmem:[%s1945_s30 + $0x298] sm:$0xff] }
  0x8c   : > { %1259 = vmatprep.subr.bf16.mxu0 %v1258_v10  ;;  %v326_v10 = vld [vmem:[%s1945_s30 + $0x1e8] sm:$0xff]  ;;  %v445_v14 = vmul.f32 %v317_v4, %v317_v4  ;;  %v443_v15 = vmul.f32 %v315_v5, %v315_v5  ;;  %v1278_v47 = vpack.c.bf16 %v464_v40, %v460_v39  ;;  %v466_v57 = vmul.f32 %v338_v49, %v338_v49  ;;  %v343_v4 = vld [vmem:[%s1945_s30 + $0x270] sm:$0xff]  ;;  %v352_v8 = vld [vmem:[%s1945_s30 + $0x2b8] sm:$0xff] }
  0x8d   : > { %v454_v18 = vmul.f32 %v326_v10, %v326_v10  ;;  %v468_v59 = vmul.f32 %v340_v51, %v340_v51  ;;  %v472_v60 = vmul.f32 %v344_v52, %v344_v52  ;;  %v346_v5 = vld [vmem:[%s1945_s30 + $0x288] sm:$0xff]  ;;  %v356_v28 = vld [vmem:[%s1945_s30 + $0x2d8] sm:$0xff] }
  0x8e   : > { %v1208_v21 = vpack.c.bf16 %v445_v14, %v441_v13  ;;  %v1272_v22 = vpack.c.bf16 %v447_v16, %v443_v15  ;;  %v471_v13 = vmul.f32 %v343_v4, %v343_v4  ;;  %v474_v14 = vmul.f32 %v346_v5, %v346_v5  ;;  %v360_v29 = vld [vmem:[%s1945_s30 + $0x2f8] sm:$0xff] }
  0x8f   : > { %v1210_v23 = vpack.c.bf16 %v454_v18, %v450_v17  ;;  %v1282_v3 = vpack.c.bf16 %v472_v60, %v468_v59  ;;  %v476_v16 = vmul.f32 %v348_v7, %v348_v7  ;;  %v480_v17 = vmul.f32 %v352_v8, %v352_v8  ;;  %v364_v48 = vld [vmem:[%s1945_s30 + $0x318] sm:$0xff] }
  0x90   : > { %v368_v49 = vld [vmem:[%s1945_s30 + $0x338] sm:$0xff] }
  0x91   : > { %v372_v4 = vld [vmem:[%s1945_s30 + $0x358] sm:$0xff] }
  0x92   : > { %1197 = vmatpush1.bf16.xpose.msra.mxu1 %v1196_v24  ;;  %v321_v24 = vld [vmem:[%s1945_s30 + $0x1c0] sm:$0xff]  ;;  %v376_v5 = vld [vmem:[%s1945_s30 + $0x378] sm:$0xff] }
  0x93   : > { %1261 = vmatpush1.bf16.xpose.msra.mxu0 %v1260_v25  ;;  %1199 = vmatprep.subr.bf16.mxu1 %v1198_v26  ;;  %v325_v25 = vld [vmem:[%s1945_s30 + $0x1e0] sm:$0xff]  ;;  %v323_v26 = vld [vmem:[%s1945_s30 + $0x1d0] sm:$0xff]  ;;  %v449_v33 = vmul.f32 %v321_v24, %v321_v24  ;;  %v1286_v24 = vpack.c.bf16 %v480_v17, %v476_v16 }
  0x94   : > { %1263 = vmatprep.subr.bf16.mxu0 %v1262_v30  ;;  %v334_v30 = vld [vmem:[%s1945_s30 + $0x228] sm:$0xff]  ;;  %v453_v34 = vmul.f32 %v325_v25, %v325_v25  ;;  %v451_v35 = vmul.f32 %v323_v26, %v323_v26  ;;  %v351_v25 = vld [vmem:[%s1945_s30 + $0x2b0] sm:$0xff] }
  0x95   : > { %v462_v38 = vmul.f32 %v334_v30, %v334_v30  ;;  %v354_v26 = vld [vmem:[%s1945_s30 + $0x2c8] sm:$0xff] }
  0x96   : > { %v1212_v41 = vpack.c.bf16 %v453_v34, %v449_v33  ;;  %v1276_v42 = vpack.c.bf16 %v455_v36, %v451_v35  ;;  %v479_v33 = vmul.f32 %v351_v25, %v351_v25  ;;  %v482_v34 = vmul.f32 %v354_v26, %v354_v26  ;;  %v380_v25 = vld [vmem:[%s1945_s30 + $0x398] sm:$0xff] }
  0x97   : > { %v1214_v43 = vpack.c.bf16 %v462_v38, %v458_v37  ;;  %v484_v36 = vmul.f32 %v356_v28, %v356_v28  ;;  %v488_v37 = vmul.f32 %v360_v29, %v360_v29  ;;  %v384_v26 = vld [vmem:[%s1945_s30 + $0x3b8] sm:$0xff] }
  0x9a   : > { %1201 = vmatpush1.bf16.xpose.msra.mxu1 %v1200_v44  ;;  %v329_v44 = vld [vmem:[%s1945_s30 + $0x200] sm:$0xff] }
  0x9b   : > { %1265 = vmatpush1.bf16.xpose.msra.mxu0 %v1264_v45  ;;  %1203 = vmatprep.subr.bf16.mxu1 %v1202_v46  ;;  %v333_v45 = vld [vmem:[%s1945_s30 + $0x220] sm:$0xff]  ;;  %v331_v46 = vld [vmem:[%s1945_s30 + $0x210] sm:$0xff]  ;;  %v457_v53 = vmul.f32 %v329_v44, %v329_v44  ;;  %v1290_v44 = vpack.c.bf16 %v488_v37, %v484_v36 }
  0x9c   : > { %1267 = vmatprep.subr.bf16.mxu0 %v1266_v50  ;;  %v342_v50 = vld [vmem:[%s1945_s30 + $0x268] sm:$0xff]  ;;  %v461_v54 = vmul.f32 %v333_v45, %v333_v45  ;;  %v459_v55 = vmul.f32 %v331_v46, %v331_v46  ;;  %v359_v45 = vld [vmem:[%s1945_s30 + $0x2f0] sm:$0xff] }
  0x9d   : > { %v470_v58 = vmul.f32 %v342_v50, %v342_v50  ;;  %v362_v46 = vld [vmem:[%s1945_s30 + $0x308] sm:$0xff] }
  0x9e   : > { %v1216_v61 = vpack.c.bf16 %v461_v54, %v457_v53  ;;  %v1280_v62 = vpack.c.bf16 %v463_v56, %v459_v55  ;;  %v487_v53 = vmul.f32 %v359_v45, %v359_v45  ;;  %v490_v54 = vmul.f32 %v362_v46, %v362_v46  ;;  %v388_v45 = vld [vmem:[%s1945_s30 + $0x3d8] sm:$0xff] }
  0x9f   : > { %v1218_v63 = vpack.c.bf16 %v470_v58, %v466_v57  ;;  %v492_v56 = vmul.f32 %v364_v48, %v364_v48  ;;  %v496_v57 = vmul.f32 %v368_v49, %v368_v49  ;;  %v392_v46 = vld [vmem:[%s1945_s30 + $0x3f8] sm:$0xff] }
  0xa2   : > { %1205 = vmatpush1.bf16.xpose.msra.mxu1 %v1204_v0  ;;  %v337_v0 = vld [vmem:[%s1945_s30 + $0x240] sm:$0xff] }
  0xa3   : > { %1269 = vmatpush1.bf16.xpose.msra.mxu0 %v1268_v1  ;;  %1207 = vmatprep.subr.bf16.mxu1 %v1206_v2  ;;  %v341_v1 = vld [vmem:[%s1945_s30 + $0x260] sm:$0xff]  ;;  %v339_v2 = vld [vmem:[%s1945_s30 + $0x250] sm:$0xff]  ;;  %v465_v10 = vmul.f32 %v337_v0, %v337_v0  ;;  %v1294_v0 = vpack.c.bf16 %v496_v57, %v492_v56 }
  0xa4   : > { %1271 = vmatprep.subr.bf16.mxu0 %v1270_v6  ;;  %v350_v6 = vld [vmem:[%s1945_s30 + $0x2a8] sm:$0xff]  ;;  %v469_v11 = vmul.f32 %v341_v1, %v341_v1  ;;  %v467_v12 = vmul.f32 %v339_v2, %v339_v2  ;;  %v367_v1 = vld [vmem:[%s1945_s30 + $0x330] sm:$0xff] }
  0xa5   : > { %v478_v15 = vmul.f32 %v350_v6, %v350_v6  ;;  %v370_v2 = vld [vmem:[%s1945_s30 + $0x348] sm:$0xff] }
  0xa6   : > { %v1220_v18 = vpack.c.bf16 %v469_v11, %v465_v10  ;;  %v1284_v19 = vpack.c.bf16 %v471_v13, %v467_v12  ;;  %v495_v10 = vmul.f32 %v367_v1, %v367_v1  ;;  %v498_v11 = vmul.f32 %v370_v2, %v370_v2 }
  0xa7   : > { %v1222_v20 = vpack.c.bf16 %v478_v15, %v474_v14  ;;  %v500_v13 = vmul.f32 %v372_v4, %v372_v4  ;;  %v504_v14 = vmul.f32 %v376_v5, %v376_v5 }
  0xaa   : > { %1209 = vmatpush1.bf16.xpose.msra.mxu1 %v1208_v21  ;;  %v345_v21 = vld [vmem:[%s1945_s30 + $0x280] sm:$0xff] }
  0xab   : > { %1273 = vmatpush1.bf16.xpose.msra.mxu0 %v1272_v22  ;;  %1211 = vmatprep.subr.bf16.mxu1 %v1210_v23  ;;  %v349_v22 = vld [vmem:[%s1945_s30 + $0x2a0] sm:$0xff]  ;;  %v347_v23 = vld [vmem:[%s1945_s30 + $0x290] sm:$0xff]  ;;  %v473_v30 = vmul.f32 %v345_v21, %v345_v21  ;;  %v1298_v21 = vpack.c.bf16 %v504_v14, %v500_v13  ;;  %v1677_v14 = vmov 1966171168  }
  0xac   : > { %1275 = vmatprep.subr.bf16.mxu0 %v1274_v27  ;;  %v358_v27 = vld [vmem:[%s1945_s30 + $0x2e8] sm:$0xff]  ;;  %v477_v31 = vmul.f32 %v349_v22, %v349_v22  ;;  %v475_v32 = vmul.f32 %v347_v23, %v347_v23  ;;  %v375_v22 = vld [vmem:[%s1945_s30 + $0x370] sm:$0xff] }
  0xad   : > { %v486_v35 = vmul.f32 %v358_v27, %v358_v27  ;;  %v378_v23 = vld [vmem:[%s1945_s30 + $0x388] sm:$0xff] }
  0xae   : > { %v1224_v38 = vpack.c.bf16 %v477_v31, %v473_v30  ;;  %v1288_v39 = vpack.c.bf16 %v479_v33, %v475_v32  ;;  %v503_v30 = vmul.f32 %v375_v22, %v375_v22  ;;  %v506_v31 = vmul.f32 %v378_v23, %v378_v23 }
  0xaf   : > { %v1226_v40 = vpack.c.bf16 %v486_v35, %v482_v34  ;;  %v508_v33 = vmul.f32 %v380_v25, %v380_v25  ;;  %v512_v34 = vmul.f32 %v384_v26, %v384_v26 }
  0xb2   : > { %1213 = vmatpush1.bf16.xpose.msra.mxu1 %v1212_v41  ;;  %v353_v41 = vld [vmem:[%s1945_s30 + $0x2c0] sm:$0xff] }
  0xb3   : > { %1277 = vmatpush1.bf16.xpose.msra.mxu0 %v1276_v42  ;;  %1215 = vmatprep.subr.bf16.mxu1 %v1214_v43  ;;  %v357_v42 = vld [vmem:[%s1945_s30 + $0x2e0] sm:$0xff]  ;;  %v355_v43 = vld [vmem:[%s1945_s30 + $0x2d0] sm:$0xff]  ;;  %v481_v50 = vmul.f32 %v353_v41, %v353_v41  ;;  %v1302_v41 = vpack.c.bf16 %v512_v34, %v508_v33 }
  0xb4   : > { %1279 = vmatprep.subr.bf16.mxu0 %v1278_v47  ;;  %v366_v47 = vld [vmem:[%s1945_s30 + $0x328] sm:$0xff]  ;;  %v485_v51 = vmul.f32 %v357_v42, %v357_v42  ;;  %v483_v52 = vmul.f32 %v355_v43, %v355_v43  ;;  %v383_v42 = vld [vmem:[%s1945_s30 + $0x3b0] sm:$0xff] }
  0xb5   : > { %v494_v55 = vmul.f32 %v366_v47, %v366_v47  ;;  %v386_v43 = vld [vmem:[%s1945_s30 + $0x3c8] sm:$0xff] }
  0xb6   : > { %v1228_v58 = vpack.c.bf16 %v485_v51, %v481_v50  ;;  %v1292_v59 = vpack.c.bf16 %v487_v53, %v483_v52  ;;  %v511_v50 = vmul.f32 %v383_v42, %v383_v42  ;;  %v514_v51 = vmul.f32 %v386_v43, %v386_v43 }
  0xb7   : > { %v1230_v60 = vpack.c.bf16 %v494_v55, %v490_v54  ;;  %v516_v53 = vmul.f32 %v388_v45, %v388_v45  ;;  %v520_v54 = vmul.f32 %v392_v46, %v392_v46 }
  0xba   : > { %1217 = vmatpush1.bf16.xpose.msra.mxu1 %v1216_v61  ;;  %v361_v61 = vld [vmem:[%s1945_s30 + $0x300] sm:$0xff] }
  0xbb   : > { %1281 = vmatpush1.bf16.xpose.msra.mxu0 %v1280_v62  ;;  %1219 = vmatprep.subr.bf16.mxu1 %v1218_v63  ;;  %v365_v62 = vld [vmem:[%s1945_s30 + $0x320] sm:$0xff]  ;;  %v363_v63 = vld [vmem:[%s1945_s30 + $0x310] sm:$0xff]  ;;  %v489_v6 = vmul.f32 %v361_v61, %v361_v61 }
  0xbc   : > { %1283 = vmatprep.subr.bf16.mxu0 %v1282_v3  ;;  %v374_v3 = vld [vmem:[%s1945_s30 + $0x368] sm:$0xff]  ;;  %v493_v7 = vmul.f32 %v365_v62, %v365_v62  ;;  %v491_v8 = vmul.f32 %v363_v63, %v363_v63  ;;  %v387_v61 = vld [vmem:[%s1945_s30 + $0x3d0] sm:$0xff] }
  0xbd   : > { %v502_v12 = vmul.f32 %v374_v3, %v374_v3  ;;  %v391_v62 = vld [vmem:[%s1945_s30 + $0x3f0] sm:$0xff]  ;;  %v515_v1 = vmul.f32 %v387_v61, %v387_v61 }
  0xbe   : > { %v1232_v15 = vpack.c.bf16 %v493_v7, %v489_v6  ;;  %v1296_v16 = vpack.c.bf16 %v495_v10, %v491_v8  ;;  %v519_v2 = vmul.f32 %v391_v62, %v391_v62 }
  0xbf   : > { %v1234_v17 = vpack.c.bf16 %v502_v12, %v498_v11 }
  0xc0   : > { %v1308_v4 = vpack.c.bf16 %v519_v2, %v515_v1 }
  0xc2   : > { %1221 = vmatpush1.bf16.xpose.msra.mxu1 %v1220_v18  ;;  %v369_v18 = vld [vmem:[%s1945_s30 + $0x340] sm:$0xff] }
  0xc3   : > { %1285 = vmatpush1.bf16.xpose.msra.mxu0 %v1284_v19  ;;  %1223 = vmatprep.subr.bf16.mxu1 %v1222_v20  ;;  %v373_v19 = vld [vmem:[%s1945_s30 + $0x360] sm:$0xff]  ;;  %v371_v20 = vld [vmem:[%s1945_s30 + $0x350] sm:$0xff]  ;;  %v497_v27 = vmul.f32 %v369_v18, %v369_v18 }
  0xc4   : > { %1287 = vmatprep.subr.bf16.mxu0 %v1286_v24  ;;  %v382_v24 = vld [vmem:[%s1945_s30 + $0x3a8] sm:$0xff]  ;;  %v501_v28 = vmul.f32 %v373_v19, %v373_v19  ;;  %v499_v29 = vmul.f32 %v371_v20, %v371_v20 }
  0xc5   : > { %v510_v32 = vmul.f32 %v382_v24, %v382_v24 }
  0xc6   : > { %v1236_v35 = vpack.c.bf16 %v501_v28, %v497_v27  ;;  %v1300_v36 = vpack.c.bf16 %v503_v30, %v499_v29 }
  0xc7   : > { %v1238_v37 = vpack.c.bf16 %v510_v32, %v506_v31 }
  0xca   : > { %1225 = vmatpush1.bf16.xpose.msra.mxu1 %v1224_v38  ;;  %v377_v38 = vld [vmem:[%s1945_s30 + $0x380] sm:$0xff] }
  0xcb   : > { %1289 = vmatpush1.bf16.xpose.msra.mxu0 %v1288_v39  ;;  %1227 = vmatprep.subr.bf16.mxu1 %v1226_v40  ;;  %v381_v39 = vld [vmem:[%s1945_s30 + $0x3a0] sm:$0xff]  ;;  %v379_v40 = vld [vmem:[%s1945_s30 + $0x390] sm:$0xff]  ;;  %v505_v47 = vmul.f32 %v377_v38, %v377_v38 }
  0xcc   : > { %1291 = vmatprep.subr.bf16.mxu0 %v1290_v44  ;;  %v390_v44 = vld [vmem:[%s1945_s30 + $0x3e8] sm:$0xff]  ;;  %v509_v48 = vmul.f32 %v381_v39, %v381_v39  ;;  %v507_v49 = vmul.f32 %v379_v40, %v379_v40 }
  0xcd   : > { %v518_v52 = vmul.f32 %v390_v44, %v390_v44 }
  0xce   : > { %v1240_v55 = vpack.c.bf16 %v509_v48, %v505_v47  ;;  %v1304_v56 = vpack.c.bf16 %v511_v50, %v507_v49 }
  0xcf   : > { %v1242_v57 = vpack.c.bf16 %v518_v52, %v514_v51 }
  0xd2   : > { %1229 = vmatpush1.bf16.xpose.msra.mxu1 %v1228_v58  ;;  %v385_v58 = vld [vmem:[%s1945_s30 + $0x3c0] sm:$0xff] }
  0xd3   : > { %1293 = vmatpush1.bf16.xpose.msra.mxu0 %v1292_v59  ;;  %1231 = vmatprep.subr.bf16.mxu1 %v1230_v60  ;;  %v389_v59 = vld [vmem:[%s1945_s30 + $0x3e0] sm:$0xff]  ;;  %v1306_v60 = vpack.c.bf16 %v520_v54, %v516_v53  ;;  %v513_v63 = vmul.f32 %v385_v58, %v385_v58 }
  0xd4   : > { %1295 = vmatprep.subr.bf16.mxu0 %v1294_v0  ;;  %v517_v0 = vmul.f32 %v389_v59, %v389_v59 }
  0xd6   : > { %v1244_v3 = vpack.c.bf16 %v517_v0, %v513_v63 }
  0xda   : > { %1233 = vmatpush1.bf16.xpose.msra.mxu1 %v1232_v15  ;;  %v673_v15 = vunpack.c.l.s4 %v1677_v14 }
  0xdb   : > { %1297 = vmatpush1.bf16.xpose.msra.mxu0 %v1296_v16  ;;  %1235 = vmatprep.subr.bf16.mxu1 %v1234_v17  ;;  %v675_v16 = vlaneseq }
  0xdc   : > { %1299 = vmatprep.subr.bf16.mxu0 %v1298_v21  ;;  %v674_v17 = vunpack.c.0.s8 %v673_v15 }
  0xdd   : > { %v676_v18 = vshrl.u32 %v675_v16, 7  ;;  %vm689_vm0 = vcmp.lt.s32.totalorder %v675_v16, 256 }
  0xe2   : > { %1237 = vmatpush1.bf16.xpose.msra.mxu1 %v1236_v35 }
  0xe3   : > { %1301 = vmatpush1.bf16.xpose.msra.mxu0 %v1300_v36  ;;  %1239 = vmatprep.subr.bf16.mxu1 %v1238_v37 }
  0xe4   : > { %1303 = vmatprep.subr.bf16.mxu0 %v1302_v41 }
  0xea   : > { %1241 = vmatpush1.bf16.xpose.msra.mxu1 %v1240_v55 }
  0xeb   : > { %1305 = vmatpush1.bf16.xpose.msra.mxu0 %v1304_v56  ;;  %1243 = vmatprep.subr.bf16.mxu1 %v1242_v57 }
  0xec   : > { %1307 = vmatprep.subr.bf16.mxu0 %v1306_v60 }
  0xf2   : > { %1245 = vmatpush1.bf16.xpose.msra.mxu1 %v1244_v3 }
  0xf3   : > { %1309 = vmatpush1.bf16.xpose.msra.mxu0 %v1308_v4 }
  0xf9   : > { %586 = vmatmul.mubr.f32.vlgmr.msra.gmra.mrb[0].mxu1 %v1676_v9 }
  0xfa   : > { %657 = vmatmul.mubr.f32.vlgmr.msra.gmra.mrb[0].mxu0 %v1676_v9  ;;  %v677_v9 = vsub.s32 %v674_v17, %v676_v18 }
 0x1cc   : > { %v587_v5 = vpop.f32.mrb[0].mxu1 }
 0x1cd   : > { %v658_v6 = vpop.f32.mrb[0].mxu0  ;;  %v589_v7 = vpop.f32.mrb[1].mxu1 }
 0x1ce   : > { %v659_v8 = vadd.f32 %v658_v6, %v587_v5  ;;  %v660_v10 = vpop.f32.mrb[1].mxu0 }
 0x1cf   : > { %v661_v11 = vadd.f32 %v660_v10, %v589_v7 }
 0x1d0   : > { %v663_v12 = vmax.f32 %v659_v8, 1e-24 }
 0x1d1   : > { %v664_v13 = vmax.f32 %v661_v11, 1e-24 }
 0x1d2   : > { %1451 = vrsqrt.f32 %v663_v12 }
 0x1d3   : > { %1453 = vrsqrt.f32 %v664_v13 }
 0x1dc   : > { %v1452_v19 = vpop.eup %1451 }
 0x1dd   : > { %v1454_v20 = vpop.eup %1453  ;;  %v667_v21 = vmul.f32 64.0, %v1452_v19 }
 0x1de   : > { %v668_v22 = vmul.f32 64.0, %v1454_v20 }
 0x1e0   : > { %v671_v23 = vcombine.low %v667_v21, %v668_v22 }
 0x1e2   : > { %v678_v24 = vrot.slane %v671_v23, %v677_v9 }
 0x1e4   : > { %v685_v25 = vrot.slane %v678_v24, %v677_v9 }
 0x1e6   : > { %691 = vst.msk [vmem:[#allocation2] sm:$0x3] %vm689_vm0, %v685_v25 }
 0x1e7 PF: > { %v695_v26 = vld [vmem:[%s1945_s30 + $0x8] sm:$0xff]  ;;  %v697_v28 = vld [vmem:[%s1945_s30 + $0x18] sm:$0xff]  ;;  %v694_v31 = vld [vmem:[%s1945_s30] sm:$0xff]  ;;  %v1678_v47 = vmov 0   ;;  %s1172_s18 = sshll.u32 %s1658_s22, 8  ;;  %s1174_s5 = sshll.u32 %s1658_s22, 1 }
 0x1e8   : > { %v699_v27 = vld [vmem:[%s1945_s30 + $0x28] sm:$0xff]  ;;  %v701_v30 = vld [vmem:[%s1945_s30 + $0x38] sm:$0xff]  ;;  %v698_v32 = vld [vmem:[%s1945_s30 + $0x20] sm:$0xff]  ;;  %1455 = vset.pattern.permute.xlu0 %v1678_v47  ;;  %s1175_s29 = sshll.u32 %s1654_s21, 3  ;;  %s1032_s22 = sshll.u32 %s1961_s27, 4  ;;  %s2250_s22 = int_to_ptr.vmem [resolvable:$true] %s1032_s22 }
 0x1e9   : > { %v823_v29 = vpack.c.bf16 %v699_v27, %v695_v26  ;;  %v825_v33 = vpack.c.bf16 %v701_v30, %v697_v28  ;;  %v822_v34 = vpack.c.bf16 %v698_v32, %v694_v31  ;;  %v696_v35 = vld [vmem:[%s1945_s30 + $0x10] sm:$0xff]  ;;  %v703_v37 = vld [vmem:[%s1945_s30 + $0x48] sm:$0xff]  ;;  %v705_v40 = vld [vmem:[%s1945_s30 + $0x58] sm:$0xff]  ;;  %s1520_s7 = scalar_lea.vmem %s2250_s22, 256  ;;  %p2363_p7 = scmp.ne.s32.totalorder %s2352_s9, 0 }
 0x1ea   : > { %v700_v36 = vld [vmem:[%s1945_s30 + $0x30] sm:$0xff]  ;;  %v707_v39 = vld [vmem:[%s1945_s30 + $0x68] sm:$0xff]  ;;  %v709_v41 = vld [vmem:[%s1945_s30 + $0x78] sm:$0xff]  ;;  %p1521_p12 = scmp.ne.s32.totalorder %s2250_s22, %s1520_s7  ;;  %s1680_s8 = smov [#allocation8]  }
 0x1eb   : > { %900 = vmatprep.subr.bf16.mxu1 %v823_v29  ;;  %v824_v38 = vpack.c.bf16 %v700_v36, %v696_v35  ;;  %941 = vmatprep.subr.bf16.mxu0 %v825_v33  ;;  %v827_v42 = vpack.c.bf16 %v707_v39, %v703_v37  ;;  %v829_v43 = vpack.c.bf16 %v709_v41, %v705_v40  ;;  %v702_v44 = vld [vmem:[%s1945_s30 + $0x40] sm:$0xff]  ;;  %v704_v46 = vld [vmem:[%s1945_s30 + $0x50] sm:$0xff]  ;;  %v711_v49 = vld [vmem:[%s1945_s30 + $0x88] sm:$0xff]  ;;  %s1524_s23 = sshll.u32 %s1680_s8, 4  ;;  %s1525_s23 = int_to_ptr.vmem [resolvable:$false] %s1524_s23 }
 0x1ec   : > { %901 = vmatpush1.bf16.xpose.msra.mxu1 %v822_v34  ;;  %v706_v45 = vld [vmem:[%s1945_s30 + $0x60] sm:$0xff]  ;;  %v708_v48 = vld [vmem:[%s1945_s30 + $0x70] sm:$0xff]  ;;  %v715_v50 = vld [vmem:[%s1945_s30 + $0xa8] sm:$0xff]  ;;  %p1522_p0 = pnand %p1521_p12, %p2363_p7  ;;  %s1526_s0 = scalar_lea.vmem %s1525_s23, 512 }
 0x1ed   : > { %942 = vmatpush1.bf16.xpose.msra.mxu0 %v824_v38  ;;  %902 = vmatprep.subr.bf16.mxu1 %v827_v42  ;;  %v713_v51 = vld [vmem:[%s1945_s30 + $0x98] sm:$0xff]  ;;  %v826_v53 = vpack.c.bf16 %v706_v45, %v702_v44  ;;  %v828_v54 = vpack.c.bf16 %v708_v48, %v704_v46  ;;  %v831_v55 = vpack.c.bf16 %v715_v50, %v711_v49  ;;  %v710_v57 = vld [vmem:[%s1945_s30 + $0x80] sm:$0xff]  ;;  %v712_v59 = vld [vmem:[%s1945_s30 + $0x90] sm:$0xff]  ;;  %p1527_p9 = scmp.lt.s32.totalorder %s2250_s22, %s1525_s23  ;;  %p1528_p8 = scmp.lt.s32.totalorder %s1526_s0, %s1520_s7 }
 0x1ee   : > { %943 = vmatprep.subr.bf16.mxu0 %v829_v43  ;;  %v717_v52 = vld [vmem:[%s1945_s30 + $0xb8] sm:$0xff]  ;;  %v714_v58 = vld [vmem:[%s1945_s30 + $0xa0] sm:$0xff]  ;;  %v716_v60 = vld [vmem:[%s1945_s30 + $0xb0] sm:$0xff]  ;;  %p1523_p2 = pneg %p1522_p0 }
 0x1ef   : > { %v833_v56 = vpack.c.bf16 %v717_v52, %v713_v51  ;;  %v719_v61 = vld [vmem:[%s1945_s30 + $0xc8] sm:$0xff]  ;;  %v721_v63 = vld [vmem:[%s1945_s30 + $0xd8] sm:$0xff]  ;;  %v830_v1 = vpack.c.bf16 %v714_v58, %v710_v57  ;;  %v832_v2 = vpack.c.bf16 %v716_v60, %v712_v59  ;;  %v718_v5 = vld [vmem:[%s1945_s30 + $0xc0] sm:$0xff]  ;;  %p1529_p10 = por %p1528_p8, %p1527_p9 }
 0x1f0   : > { %v723_v62 = vld [vmem:[%s1945_s30 + $0xe8] sm:$0xff]  ;;  %v725_v0 = vld [vmem:[%s1945_s30 + $0xf8] sm:$0xff]  ;;  %v722_v6 = vld [vmem:[%s1945_s30 + $0xe0] sm:$0xff] }
 0x1f1   : > { %v835_v3 = vpack.c.bf16 %v723_v62, %v719_v61  ;;  %v837_v4 = vpack.c.bf16 %v725_v0, %v721_v63  ;;  %v720_v7 = vld [vmem:[%s1945_s30 + $0xd0] sm:$0xff]  ;;  %v727_v10 = vld [vmem:[%s1945_s30 + $0x108] sm:$0xff]  ;;  %v729_v12 = vld [vmem:[%s1945_s30 + $0x118] sm:$0xff]  ;;  %v834_v14 = vpack.c.bf16 %v722_v6, %v718_v5  ;;  %p1530_p6 = pnand %p1529_p10, %p1523_p2 }
 0x1f2   : > { %v724_v8 = vld [vmem:[%s1945_s30 + $0xf0] sm:$0xff]  ;;  %v731_v11 = vld [vmem:[%s1945_s30 + $0x128] sm:$0xff]  ;;  %v733_v13 = vld [vmem:[%s1945_s30 + $0x138] sm:$0xff] }
 0x1f3   : > { %v836_v15 = vpack.c.bf16 %v724_v8, %v720_v7  ;;  %v839_v16 = vpack.c.bf16 %v731_v11, %v727_v10  ;;  %v841_v17 = vpack.c.bf16 %v733_v13, %v729_v12  ;;  %v726_v18 = vld [vmem:[%s1945_s30 + $0x100] sm:$0xff]  ;;  %v728_v20 = vld [vmem:[%s1945_s30 + $0x110] sm:$0xff]  ;;  %v735_v22 = vld [vmem:[%s1945_s30 + $0x148] sm:$0xff] }
 0x1f4   : > { %903 = vmatpush1.bf16.xpose.msra.mxu1 %v826_v53  ;;  %v730_v19 = vld [vmem:[%s1945_s30 + $0x120] sm:$0xff]  ;;  %v732_v21 = vld [vmem:[%s1945_s30 + $0x130] sm:$0xff]  ;;  %v739_v9 = vld [vmem:[%s1945_s30 + $0x168] sm:$0xff] }
 0x1f5   : > { %944 = vmatpush1.bf16.xpose.msra.mxu0 %v828_v54  ;;  %904 = vmatprep.subr.bf16.mxu1 %v831_v55  ;;  %v737_v23 = vld [vmem:[%s1945_s30 + $0x158] sm:$0xff]  ;;  %v838_v25 = vpack.c.bf16 %v730_v19, %v726_v18  ;;  %v840_v26 = vpack.c.bf16 %v732_v21, %v728_v20  ;;  %v843_v27 = vpack.c.bf16 %v739_v9, %v735_v22  ;;  %v734_v29 = vld [vmem:[%s1945_s30 + $0x140] sm:$0xff]  ;;  %v736_v31 = vld [vmem:[%s1945_s30 + $0x150] sm:$0xff] }
 0x1f6   : > { %945 = vmatprep.subr.bf16.mxu0 %v833_v56  ;;  %v741_v24 = vld [vmem:[%s1945_s30 + $0x178] sm:$0xff]  ;;  %v738_v30 = vld [vmem:[%s1945_s30 + $0x160] sm:$0xff]  ;;  %v740_v32 = vld [vmem:[%s1945_s30 + $0x170] sm:$0xff] }
 0x1f7   : > { %v845_v28 = vpack.c.bf16 %v741_v24, %v737_v23  ;;  %v743_v33 = vld [vmem:[%s1945_s30 + $0x188] sm:$0xff]  ;;  %v745_v35 = vld [vmem:[%s1945_s30 + $0x198] sm:$0xff]  ;;  %v842_v37 = vpack.c.bf16 %v738_v30, %v734_v29  ;;  %v844_v38 = vpack.c.bf16 %v740_v32, %v736_v31  ;;  %v2150_v41 = vld [vmem:[%s214_s11] sm:$0xff] }
 0x1f8   : > { %v747_v34 = vld [vmem:[%s1945_s30 + $0x1a8] sm:$0xff]  ;;  %v749_v36 = vld [vmem:[%s1945_s30 + $0x1b8] sm:$0xff]  ;;  %v1169_v42 = vcombine.high %v2150_v41, %v2150_v41  ;;  %v742_v46 = vld [vmem:[%s1945_s30 + $0x180] sm:$0xff] }
 0x1f9   : > { %v847_v39 = vpack.c.bf16 %v747_v34, %v743_v33  ;;  %v849_v40 = vpack.c.bf16 %v749_v36, %v745_v35  ;;  %v2156_v43 = vld [vmem:[%s214_s11 + $0x8] sm:$0xff]  ;;  %v746_v47 = vld [vmem:[%s1945_s30 + $0x1a0] sm:$0xff]  ;;  %v744_v48 = vld [vmem:[%s1945_s30 + $0x190] sm:$0xff]  ;;  %s1028_s11 = sadd.s32 %s1175_s29, %s1174_s5 }
 0x1fa   : > { %v989_v44 = vld [vmem:[%s1959_s28] sm:$0xff]  ;;  %v1171_v45 = vcombine.high %v2156_v43, %v2156_v43  ;;  %v748_v49 = vld [vmem:[%s1945_s30 + $0x1b0] sm:$0xff]  ;;  %v751_v50 = vld [vmem:[%s1945_s30 + $0x1c8] sm:$0xff]  ;;  %932 = vmatprep.mubr.bf16.mxu1 %v1169_v42  ;;  %v846_v54 = vpack.c.bf16 %v746_v47, %v742_v46  ;;  %s1176_s21 = sshll.u32 %s1028_s11, 7 }
 0x1fb   : > { %991 = vperm.xlu0 %1455, %v989_v44   ;;  %v755_v51 = vld [vmem:[%s1945_s30 + $0x1e8] sm:$0xff]  ;;  %v753_v52 = vld [vmem:[%s1945_s30 + $0x1d8] sm:$0xff]  ;;  %v848_v55 = vpack.c.bf16 %v748_v49, %v744_v48  ;;  %v750_v58 = vld [vmem:[%s1945_s30 + $0x1c0] sm:$0xff]  ;;  %s2248_s10 = scalar_lea.hbm %s2332_s3, %s1176_s21 }
 0x1fc   : > { %905 = vmatpush1.bf16.xpose.msra.mxu1 %v830_v1  ;;  %v757_v53 = vld [vmem:[%s1945_s30 + $0x1f8] sm:$0xff]  ;;  %973 = vmatprep.mubr.bf16.mxu0 %v1171_v45  ;;  %v851_v56 = vpack.c.bf16 %v755_v51, %v751_v50  ;;  %v754_v59 = vld [vmem:[%s1945_s30 + $0x1e0] sm:$0xff]  ;;  %v752_v60 = vld [vmem:[%s1945_s30 + $0x1d0] sm:$0xff] }
 0x1fd   : > { %946 = vmatpush1.bf16.xpose.msra.mxu0 %v832_v2  ;;  %906 = vmatprep.subr.bf16.mxu1 %v835_v3  ;;  %v853_v57 = vpack.c.bf16 %v757_v53, %v753_v52  ;;  %v756_v61 = vld [vmem:[%s1945_s30 + $0x1f0] sm:$0xff]  ;;  %v759_v62 = vld [vmem:[%s1945_s30 + $0x208] sm:$0xff]  ;;  %v761_v0 = vld [vmem:[%s1945_s30 + $0x218] sm:$0xff]  ;;  %v850_v2 = vpack.c.bf16 %v754_v59, %v750_v58 }
 0x1fe   : > { %947 = vmatprep.subr.bf16.mxu0 %v837_v4  ;;  %v763_v63 = vld [vmem:[%s1945_s30 + $0x228] sm:$0xff]  ;;  %v765_v1 = vld [vmem:[%s1945_s30 + $0x238] sm:$0xff]  ;;  %v852_v3 = vpack.c.bf16 %v756_v61, %v752_v60  ;;  %v758_v6 = vld [vmem:[%s1945_s30 + $0x200] sm:$0xff] }
 0x1ff   : > { %v855_v4 = vpack.c.bf16 %v763_v63, %v759_v62  ;;  %v857_v5 = vpack.c.bf16 %v765_v1, %v761_v0  ;;  %v762_v7 = vld [vmem:[%s1945_s30 + $0x220] sm:$0xff]  ;;  %v760_v8 = vld [vmem:[%s1945_s30 + $0x210] sm:$0xff]  ;;  %v767_v11 = vld [vmem:[%s1945_s30 + $0x248] sm:$0xff] }
 0x200   : > { %v764_v10 = vld [vmem:[%s1945_s30 + $0x230] sm:$0xff]  ;;  %v771_v12 = vld [vmem:[%s1945_s30 + $0x268] sm:$0xff]  ;;  %v769_v13 = vld [vmem:[%s1945_s30 + $0x258] sm:$0xff] }
 0x201   : > { %v766_v19 = vld [vmem:[%s1945_s30 + $0x240] sm:$0xff]  ;;  %v768_v21 = vld [vmem:[%s1945_s30 + $0x250] sm:$0xff]  ;;  %v775_v9 = vld [vmem:[%s1945_s30 + $0x288] sm:$0xff] }
 0x202   : > { %v770_v20 = vld [vmem:[%s1945_s30 + $0x260] sm:$0xff]  ;;  %v772_v22 = vld [vmem:[%s1945_s30 + $0x270] sm:$0xff]  ;;  %v779_v23 = vld [vmem:[%s1945_s30 + $0x2a8] sm:$0xff] }
 0x203   : > { %v777_v24 = vld [vmem:[%s1945_s30 + $0x298] sm:$0xff]  ;;  %v774_v30 = vld [vmem:[%s1945_s30 + $0x280] sm:$0xff]  ;;  %v776_v32 = vld [vmem:[%s1945_s30 + $0x290] sm:$0xff] }
 0x204   : > { %907 = vmatpush1.bf16.xpose.msra.mxu1 %v834_v14  ;;  %v773_v14 = vld [vmem:[%s1945_s30 + $0x278] sm:$0xff]  ;;  %v778_v31 = vld [vmem:[%s1945_s30 + $0x2a0] sm:$0xff]  ;;  %v780_v33 = vld [vmem:[%s1945_s30 + $0x2b0] sm:$0xff] }
 0x205   : > { %948 = vmatpush1.bf16.xpose.msra.mxu0 %v836_v15  ;;  %908 = vmatprep.subr.bf16.mxu1 %v839_v16  ;;  %v854_v15 = vpack.c.bf16 %v762_v7, %v758_v6  ;;  %v856_v16 = vpack.c.bf16 %v764_v10, %v760_v8  ;;  %v861_v18 = vpack.c.bf16 %v773_v14, %v769_v13  ;;  %v783_v34 = vld [vmem:[%s1945_s30 + $0x2c8] sm:$0xff]  ;;  %v785_v36 = vld [vmem:[%s1945_s30 + $0x2d8] sm:$0xff]  ;;  %v782_v44 = vld [vmem:[%s1945_s30 + $0x2c0] sm:$0xff] }
 0x206   : > { %949 = vmatprep.subr.bf16.mxu0 %v841_v17  ;;  %v859_v17 = vpack.c.bf16 %v771_v12, %v767_v11  ;;  %v787_v35 = vld [vmem:[%s1945_s30 + $0x2e8] sm:$0xff]  ;;  %v786_v45 = vld [vmem:[%s1945_s30 + $0x2e0] sm:$0xff]  ;;  %v784_v46 = vld [vmem:[%s1945_s30 + $0x2d0] sm:$0xff] }
 0x207   : > { %v788_v47 = vld [vmem:[%s1945_s30 + $0x2f0] sm:$0xff]  ;;  %v791_v48 = vld [vmem:[%s1945_s30 + $0x308] sm:$0xff]  ;;  %v793_v50 = vld [vmem:[%s1945_s30 + $0x318] sm:$0xff]  ;;  %v866_v52 = vpack.c.bf16 %v786_v45, %v782_v44 }
 0x208   : > { %v795_v49 = vld [vmem:[%s1945_s30 + $0x328] sm:$0xff]  ;;  %v797_v51 = vld [vmem:[%s1945_s30 + $0x338] sm:$0xff]  ;;  %v868_v53 = vpack.c.bf16 %v788_v47, %v784_v46  ;;  %v792_v58 = vld [vmem:[%s1945_s30 + $0x310] sm:$0xff] }
 0x209   : > { %v796_v59 = vld [vmem:[%s1945_s30 + $0x330] sm:$0xff]  ;;  %v799_v60 = vld [vmem:[%s1945_s30 + $0x348] sm:$0xff]  ;;  %v801_v62 = vld [vmem:[%s1945_s30 + $0x358] sm:$0xff] }
 0x20a   : > { %v803_v61 = vld [vmem:[%s1945_s30 + $0x368] sm:$0xff]  ;;  %v805_v63 = vld [vmem:[%s1945_s30 + $0x378] sm:$0xff]  ;;  %v872_v1 = vpack.c.bf16 %v796_v59, %v792_v58  ;;  %v800_v6 = vld [vmem:[%s1945_s30 + $0x350] sm:$0xff] }
 0x20b   : > { %v804_v7 = vld [vmem:[%s1945_s30 + $0x370] sm:$0xff]  ;;  %v807_v8 = vld [vmem:[%s1945_s30 + $0x388] sm:$0xff]  ;;  %v809_v11 = vld [vmem:[%s1945_s30 + $0x398] sm:$0xff] }
 0x20c   : > { %909 = vmatpush1.bf16.xpose.msra.mxu1 %v838_v25  ;;  %v781_v25 = vld [vmem:[%s1945_s30 + $0x2b8] sm:$0xff]  ;;  %v811_v10 = vld [vmem:[%s1945_s30 + $0x3a8] sm:$0xff]  ;;  %v876_v14 = vpack.c.bf16 %v804_v7, %v800_v6 }
 0x20d   : > { %950 = vmatpush1.bf16.xpose.msra.mxu0 %v840_v26  ;;  %910 = vmatprep.subr.bf16.mxu1 %v843_v27  ;;  %v858_v26 = vpack.c.bf16 %v770_v20, %v766_v19  ;;  %v860_v27 = vpack.c.bf16 %v772_v22, %v768_v21  ;;  %v865_v29 = vpack.c.bf16 %v781_v25, %v777_v24  ;;  %v813_v12 = vld [vmem:[%s1945_s30 + $0x3b8] sm:$0xff]  ;;  %v808_v19 = vld [vmem:[%s1945_s30 + $0x390] sm:$0xff]  ;;  %v815_v21 = vld [vmem:[%s1945_s30 + $0x3c8] sm:$0xff] }
 0x20e   : > { %951 = vmatprep.subr.bf16.mxu0 %v845_v28  ;;  %v863_v28 = vpack.c.bf16 %v779_v23, %v775_v9  ;;  %v812_v20 = vld [vmem:[%s1945_s30 + $0x3b0] sm:$0xff]  ;;  %v819_v22 = vld [vmem:[%s1945_s30 + $0x3e8] sm:$0xff]  ;;  %v817_v9 = vld [vmem:[%s1945_s30 + $0x3d8] sm:$0xff] }
 0x20f   : > { %v821_v23 = vld [vmem:[%s1945_s30 + $0x3f8] sm:$0xff]  ;;  %v880_v25 = vpack.c.bf16 %v812_v20, %v808_v19 }
 0x210   : > { %v997_v45 = vld [vmem:[#allocation2] sm:$0x3] }
 0x214   : > { %911 = vmatpush1.bf16.xpose.msra.mxu1 %v842_v37  ;;  %v789_v37 = vld [vmem:[%s1945_s30 + $0x2f8] sm:$0xff] }
 0x215   : > { %952 = vmatpush1.bf16.xpose.msra.mxu0 %v844_v38  ;;  %912 = vmatprep.subr.bf16.mxu1 %v847_v39  ;;  %v862_v38 = vpack.c.bf16 %v778_v31, %v774_v30  ;;  %v864_v39 = vpack.c.bf16 %v780_v33, %v776_v32  ;;  %v869_v42 = vpack.c.bf16 %v789_v37, %v785_v36  ;;  %v816_v30 = vld [vmem:[%s1945_s30 + $0x3d0] sm:$0xff]  ;;  %v983_v36 = vlaneseq }
 0x216   : > { %953 = vmatprep.subr.bf16.mxu0 %v849_v40  ;;  %v867_v40 = vpack.c.bf16 %v787_v35, %v783_v34  ;;  %v820_v31 = vld [vmem:[%s1945_s30 + $0x3f0] sm:$0xff]  ;;  %v1168_v34 = vcombine.low %v2150_v41, %v2150_v41  ;;  %v1170_v35 = vcombine.low %v2156_v43, %v2156_v43 }
 0x217   : > { %v884_v33 = vpack.c.bf16 %v820_v31, %v816_v30  ;;  %v984_v37 = vand.u32 127, %v983_v36 }
 0x21c   : > { %913 = vmatpush1.bf16.xpose.msra.mxu1 %v846_v54  ;;  %v871_v54 = vpack.c.bf16 %v795_v49, %v791_v48 }
 0x21d   : > { %954 = vmatpush1.bf16.xpose.msra.mxu0 %v848_v55  ;;  %914 = vmatprep.subr.bf16.mxu1 %v851_v56  ;;  %v873_v55 = vpack.c.bf16 %v797_v51, %v793_v50  ;;  %v790_v56 = vld [vmem:[%s1945_s30 + $0x300] sm:$0xff] }
 0x21e   : > { %955 = vmatprep.subr.bf16.mxu0 %v853_v57  ;;  %v794_v57 = vld [vmem:[%s1945_s30 + $0x320] sm:$0xff] }
 0x21f   : > { %v870_v0 = vpack.c.bf16 %v794_v57, %v790_v56  ;;  %v1679_v56 = vmov 0.0  }
 0x224   : > { %915 = vmatpush1.bf16.xpose.msra.mxu1 %v850_v2  ;;  %v875_v2 = vpack.c.bf16 %v803_v61, %v799_v60 }
 0x225   : > { %956 = vmatpush1.bf16.xpose.msra.mxu0 %v852_v3  ;;  %916 = vmatprep.subr.bf16.mxu1 %v855_v4  ;;  %v877_v3 = vpack.c.bf16 %v805_v63, %v801_v62  ;;  %v798_v4 = vld [vmem:[%s1945_s30 + $0x340] sm:$0xff] }
 0x226   : > { %957 = vmatprep.subr.bf16.mxu0 %v857_v5  ;;  %v802_v5 = vld [vmem:[%s1945_s30 + $0x360] sm:$0xff] }
 0x227   : > { %v874_v13 = vpack.c.bf16 %v802_v5, %v798_v4 }
 0x22c   : > { %917 = vmatpush1.bf16.xpose.msra.mxu1 %v854_v15  ;;  %v879_v15 = vpack.c.bf16 %v811_v10, %v807_v8 }
 0x22d   : > { %958 = vmatpush1.bf16.xpose.msra.mxu0 %v856_v16  ;;  %918 = vmatprep.subr.bf16.mxu1 %v859_v17  ;;  %v881_v16 = vpack.c.bf16 %v813_v12, %v809_v11  ;;  %v806_v17 = vld [vmem:[%s1945_s30 + $0x380] sm:$0xff] }
 0x22e   : > { %959 = vmatprep.subr.bf16.mxu0 %v861_v18  ;;  %v810_v18 = vld [vmem:[%s1945_s30 + $0x3a0] sm:$0xff] }
 0x22f   : > { %v878_v24 = vpack.c.bf16 %v810_v18, %v806_v17 }
 0x234   : > { %919 = vmatpush1.bf16.xpose.msra.mxu1 %v858_v26  ;;  %v883_v26 = vpack.c.bf16 %v819_v22, %v815_v21 }
 0x235   : > { %960 = vmatpush1.bf16.xpose.msra.mxu0 %v860_v27  ;;  %920 = vmatprep.subr.bf16.mxu1 %v863_v28  ;;  %v885_v27 = vpack.c.bf16 %v821_v23, %v817_v9  ;;  %v814_v28 = vld [vmem:[%s1945_s30 + $0x3c0] sm:$0xff] }
 0x236   : > { %961 = vmatprep.subr.bf16.mxu0 %v865_v29  ;;  %v818_v29 = vld [vmem:[%s1945_s30 + $0x3e0] sm:$0xff]  ;;  %s1016_s30 = scalar_lea.sflag [#allocation5], %s252_s15 }
 0x237   : > { %v882_v32 = vpack.c.bf16 %v818_v29, %v814_v28 }
 0x23c   : > { %921 = vmatpush1.bf16.xpose.msra.mxu1 %v862_v38  ;;  %v1000_v38 = vshrl.u32 %v983_v36, 7 }
 0x23d   : > { %962 = vmatpush1.bf16.xpose.msra.mxu0 %v864_v39  ;;  %922 = vmatprep.subr.bf16.mxu1 %v867_v40  ;;  %v985_v39 = vadd.s32 128, %v984_v37  ;;  %v986_v40 = vstv %s1172_s18 }
 0x23e   : > { %963 = vmatprep.subr.bf16.mxu0 %v869_v42  ;;  %v1001_v42 = vsub.s32 0, %v1000_v38  ;;  %v987_v44 = vadd.s32 %v986_v40, %v984_v37  ;;  %v1005_v46 = vsub.s32 1, %v1000_v38 }
 0x23f   : > { %v988_v48 = vadd.s32 %v986_v40, %v985_v39 }
 0x240   : > { %v1002_v49 = vrot.slane %v997_v45, %v1001_v42  ;;  %v1006_v51 = vrot.slane %v997_v45, %v1005_v46 }
 0x244   : > { %923 = vmatpush1.bf16.xpose.msra.mxu1 %v866_v52 }
 0x245   : > { %964 = vmatpush1.bf16.xpose.msra.mxu0 %v868_v53  ;;  %924 = vmatprep.subr.bf16.mxu1 %v871_v54 }
 0x246   : > { %965 = vmatprep.subr.bf16.mxu0 %v873_v55 }
 0x24c   : > { %925 = vmatpush1.bf16.xpose.msra.mxu1 %v870_v0 }
 0x24d   : > { %966 = vmatpush1.bf16.xpose.msra.mxu0 %v872_v1  ;;  %926 = vmatprep.subr.bf16.mxu1 %v875_v2 }
 0x24e   : > { %967 = vmatprep.subr.bf16.mxu0 %v877_v3 }
 0x254   : > { %927 = vmatpush1.bf16.xpose.msra.mxu1 %v874_v13 }
 0x255   : > { %968 = vmatpush1.bf16.xpose.msra.mxu0 %v876_v14  ;;  %928 = vmatprep.subr.bf16.mxu1 %v879_v15 }
 0x256   : > { %969 = vmatprep.subr.bf16.mxu0 %v881_v16 }
 0x25c   : > { %929 = vmatpush1.bf16.xpose.msra.mxu1 %v878_v24 }
 0x25d   : > { %970 = vmatpush1.bf16.xpose.msra.mxu0 %v880_v25  ;;  %930 = vmatprep.subr.bf16.mxu1 %v883_v26 }
 0x25e   : > { %971 = vmatprep.subr.bf16.mxu0 %v885_v27 }
 0x264   : > { %931 = vmatpush1.bf16.xpose.msra.mxu1 %v882_v32 }
 0x265   : > { %972 = vmatpush1.bf16.xpose.msra.mxu0 %v884_v33 }
 0x26b   : > { %933 = vmatmul.mubr.bf16.vlgmr.msra.gmra.mrb[0].mxu1 %v1168_v34 }
 0x26c   : > { %974 = vmatmul.mubr.bf16.vlgmr.msra.gmra.mrb[0].mxu0 %v1170_v35 }
 0x27a   : > { %v992_v47 = vpop.permute.xlu0 %991 }
 0x27b   : > { %vm993_vm1 = vcmp.eq.s32.totalorder %v992_v47, %v987_v44  ;;  %vm994_vm2 = vcmp.eq.s32.totalorder %v992_v47, %v988_v48 }
 0x27c   : > { %v995_v57 = vsel %vm993_vm1, 22.4, %v1679_v56  ;;  %v996_v61 = vsel %vm994_vm2, 22.4, %v1679_v56 }
 0x33e   : > { %v934_v41 = vpop.f32.mrb[0].mxu1 }
 0x33f   : > { %v975_v43 = vpop.f32.mrb[0].mxu0  ;;  %v936_v50 = vpop.f32.mrb[1].mxu1 }
 0x340   : > { %v976_v52 = vadd.f32 %v975_v43, %v934_v41  ;;  %v977_v53 = vpop.f32.mrb[1].mxu0  ;;  %v938_v54 = vpop.f32.mrb[2].mxu1 }
 0x341   : > { %v978_v55 = vadd.f32 %v977_v53, %v936_v50  ;;  %v979_v58 = vpop.f32.mrb[2].mxu0  ;;  %v939_v59 = vpop.f32.mrb[3].mxu1 }
 0x342   : > { %v1009_v60 = vmul.f32 %v1002_v49, %v976_v52  ;;  %v980_v62 = vpop.f32.mrb[3].mxu0 }
 0x343   : > { %v1010_v63 = vmul.f32 %v1006_v51, %v978_v55 }
 0x344   : > { %v1011_v0 = vsub.f32 %v1009_v60, %v995_v57 }
 0x345   : > { %v1012_v1 = vsub.f32 %v1010_v63, %v996_v61 }
 0x346   : > { %1013 = vst [vmem:[%s1961_s27] sm:$0xff] %v1011_v0 }
 0x347   : > { %1014 = vst [vmem:[%s1961_s27 + $0x8] sm:$0xff] %v1012_v1 }
 0x348   : > { %1533 = shalt.err (!%p1530_p6)
}
 0x349   : > { %s1534_s15 = scalar_lea.hbm %s2248_s10, 256  ;;  %s1538_s27 = scalar_lea.hbm %s2332_s3, 2048 }
 0x34a   : > { %p1535_p4 = scmp.ne.s32.totalorder %s2248_s10, %s1534_s15  ;;  %p1539_p11 = scmp.lt.u32.totalorder %s2248_s10, %s2332_s3 }
 0x34b   : > { %p1540_p1 = scmp.lt.u32.totalorder %s1538_s27, %s1534_s15  ;;  %p1542_p12 = scmp.lt.u32.totalorder %s1534_s15, %s2248_s10 }
 0x34c   : > { %p1536_p3 = pnand %p1535_p4, %p2363_p7 }
 0x34d   : > { %p1541_p5 = por %p1540_p1, %p1539_p11 }
 0x34e   : > { %p1537_p13 = pneg %p1536_p3 }
 0x34f   : > { %p1543_p0 = por %p1542_p12, %p1541_p5 }
 0x351   : > { %p1544_p2 = pnand %p1543_p0, %p1537_p13 }
 0x353   : > { %1547 = shalt.err (!%p1544_p2)
}
 0x354   : > { %1318 = dma.vmem_to_hbm [thread:$0]  (%p2363_p7), %s2250_s22, 256, %s2248_s10, %s1016_s30  }
 0x355 PF: > { %p1332_p9 = scmp.ge.s32.totalorder %s1670_s25, 2  ;;  %s1044_s29 = sand.u32 1, %s1618_s12  }
 0x356   : > { %p2364_p8 = scmp.ne.s32.totalorder %s2354_s4, 0  ;;  %s1045_s11 = scalar_lea.sflag [#allocation5], %s1044_s29 }
 0x358   : > { %p1328_p10 = pnand %p1332_p9, %p2364_p8 }
 0x35a   : > { %1613 = dma.done.wait (!%p1328_p10), %s1045_s11, 256  }
 0x35b   : > { %1615 = vsyncadd (!%p1328_p10), %s1045_s11, 4294967040  ;;  %s22_s25 = sadd.s32 1, %s1670_s25   ;;  %s2366_s9 = sld [smem:[#allocation18_spill]] }
 0x35c   : > { %p2282_p6 = scmp.ge.s32.totalorder %s22_s25, 10   ;;  %s2367_s22 = sld [smem:[#allocation17_spill]] }
 0x35d   : > { %s2368_s6 = sld [smem:[#allocation16_spill]]  ;;  %s2369_s4 = sld [smem:[#allocation12_spill]] }
 0x35e   : > { %s2370_s26 = sld [smem:[#allocation13_spill]]  ;;  %s2371_s23 = sld [smem:[#allocation14_spill]] }
 0x35f   : > { %s2372_s24 = sld [smem:[#allocation15_spill]]  ;;  %s2374_s12 = smov %s1622_s13 }
 0x360   : > { %s2375_s13 = smov %s1626_s14  ;;  %s2377_s15 = smov %s1634_s16 }
 0x361   : > { %s2376_s14 = smov %s2366_s9  ;;  %s2378_s16 = smov %s1638_s17 }
 0x362   : > { %s2379_s17 = smov %s2367_s22  ;;  %s2380_s18 = smov %s1646_s19 }
 0x363   : > { %s2381_s19 = smov %s1650_s20  ;;  %s2382_s20 = smov %s2368_s6 }
 0x364   : > { %s2383_s21 = smov %s2369_s4  ;;  %s2384_s22 = smov %s2370_s26 }
 0x365   :  { %21 = sbr.rel (!%p2282_p6) target bundleno = 14 (0xe), region = 97 }
 0x36c   :  { %1050 = vsyncpa [#allocation4], 1 }
 0x36d   :  { %1052 = vsyncpa [#allocation4 + $0x1], 1 }
 0x36e   :  { %1053 = vsyncpa [#allocation7], 1 }
 0x36f   :  { %1055 = vsyncpa [#allocation7 + $0x1], 1 }
 0x370   :  { %1056 = vsyncpa [#allocation5], 1 }
 0x371   :  { %1058 = vsyncpa [#allocation5 + $0x1], 1 }

</bundles_post_ra>
